<compile_context>
chip_gen: v6e
topology: v6e:2x2x1
jax: 0.10.0
libtpu: 0.0.40
codegen_flags: <defaults>
</compile_context>

<pallas_src>
import functools

import jax
import jax.numpy as jnp
import numpy as np
from jax.experimental import pallas as pl
from jax.experimental.pallas import tpu as pltpu

DIM = 3    # input point dimension
F = 16     # mlpF feature width
K = 10     # KNN_size


# ---------------------------------------------------------------------------
# Pass 1: global (dim=0, i.e. batch-axis) softmax statistics, online over N.
# ---------------------------------------------------------------------------
def _stats_kernel(nvalid_ref, weff_ref, beff_ref,      # SMEM scalars
                  xknn_ref, x_ref,                     # VMEM tiles
                  m_ref, l_ref,                        # VMEM out (K, 1)
                  m_sc, l_sc):                         # VMEM scratch (K, 1)
    t = pl.program_id(0)

    @pl.when(t == 0)
    def _init():
        m_sc[...] = jnp.full_like(m_sc, -jnp.inf)
        l_sc[...] = jnp.zeros_like(l_sc)

    w0 = weff_ref[0]
    w1 = weff_ref[1]
    w2 = weff_ref[2]
    be = beff_ref[0]

    # logits[k, n] = (w_eff·xknn[:, k, n] + b_eff) + (w_eff·x[:, n] + b_eff)
    s = 2.0 * be + w0 * x_ref[0:1, :] + w1 * x_ref[1:2, :] + w2 * x_ref[2:3, :]
    logits = w0 * xknn_ref[0] + w1 * xknn_ref[1] + w2 * xknn_ref[2] + s   # (K, TN)

    tn = logits.shape[1]
    lane = jax.lax.broadcasted_iota(jnp.int32, logits.shape, 1)
    valid = (t * tn + lane) < nvalid_ref[0]
    masked = jnp.where(valid, logits, -jnp.inf)

    tile_max = jnp.max(masked, axis=1, keepdims=True)                    # (K, 1)
    m_new = jnp.maximum(m_sc[...], tile_max)
    alpha = jnp.exp(m_sc[...] - m_new)
    p = jnp.exp(masked - m_new)                                          # padded lanes -> 0
    l_sc[...] = alpha * l_sc[...] + jnp.sum(p, axis=1, keepdims=True)
    m_sc[...] = m_new

    @pl.when(t == pl.num_programs(0) - 1)
    def _fin():
        m_ref[...] = m_sc[...]
        l_ref[...] = l_sc[...]


# ---------------------------------------------------------------------------
# Pass 2: x2 = mlpF(xknn) (flat, aliased to its raw byte layout) + attention.
# ---------------------------------------------------------------------------
def _gap_kernel(weff_ref, beff_ref, wF_ref, bF_ref,    # SMEM scalars
                m_ref, l_ref, xknn_ref, x_ref,         # VMEM in
                x2_ref, attn_ref):                     # VMEM out
    w0 = weff_ref[0]
    w1 = weff_ref[1]
    w2 = weff_ref[2]
    be = beff_ref[0]

    xk0 = xknn_ref[0]                                  # (K, TN)
    xk1 = xknn_ref[1]
    xk2 = xknn_ref[2]

    # softmax over the batch axis (lanes) with the precomputed global stats
    s = 2.0 * be + w0 * x_ref[0:1, :] + w1 * x_ref[1:2, :] + w2 * x_ref[2:3, :]
    logits = w0 * xk0 + w1 * xk1 + w2 * xk2 + s                          # (K, TN)
    xc = jnp.exp(logits - m_ref[...]) / l_ref[...]                       # (K, TN)

    # h = mlpF(xknn): stream each feature's (K, TN) rows straight into the
    # flat x2 output (row index f*K + k == torch's raw per-point byte layout)
    for f in range(F):
        h_f = (bF_ref[f]
               + wF_ref[f, 0] * xk0
               + wF_ref[f, 1] * xk1
               + wF_ref[f, 2] * xk2)                                     # (K, TN)
        x2_ref[f * K:(f + 1) * K, :] = h_f

    # x_attn = bmm(xc, x2.reshape(N, K, F)): read the x2 block back in
    # 8-aligned 16-row slabs (rows [k*F, (k+1)*F) == x2[:, k, :] transposed)
    tn = attn_ref.shape[1]
    acc = jnp.zeros((F, tn), dtype=jnp.float32)
    for k in range(K):
        slab = x2_ref[k * F:(k + 1) * F, :]                              # (F, TN)
        acc = acc + xc[k:k + 1, :] * slab
    attn_ref[...] = acc


# ---------------------------------------------------------------------------
# Wrapper
# ---------------------------------------------------------------------------
@functools.partial(jax.jit, static_argnames=("block_n",))
def single_gap(xknn, x, wF, bF, w1, b1, block_n=128):
    """xknn: (N, DIM, K), x: (N, DIM).  Returns (x_attn (N, F), x2 (N, K, F))."""
    N = xknn.shape[0]
    n_tiles = (N + block_n - 1) // block_n
    n_pad = n_tiles * block_n

    # transposed working layout: N on the 128-lane axis
    xknn_t = jnp.transpose(xknn.astype(jnp.float32), (1, 2, 0))          # (DIM, K, N)
    x_t = jnp.transpose(x.astype(jnp.float32), (1, 0))                   # (DIM, N)
    pad = n_pad - N
    if pad:
        xknn_t = jnp.pad(xknn_t, ((0, 0), (0, 0), (0, pad)))
        x_t = jnp.pad(x_t, ((0, 0), (0, pad)))

    wF = wF.astype(jnp.float32)
    bF = bF.astype(jnp.float32)
    w1 = w1.astype(jnp.float32)
    b1 = b1.astype(jnp.float32)

    # mlp1 ∘ mlpF folded: logit branch = w_eff·(.) + b_eff
    w_eff = jnp.dot(w1, wF)                                              # (DIM,)
    b_eff = (jnp.dot(w1, bF) + b1[0]).reshape(1)                         # (1,)
    nvalid = jnp.array([N], dtype=jnp.int32)

    smem = pl.BlockSpec(memory_space=pltpu.MemorySpace.SMEM)

    # ---- pass 1: global softmax stats over the batch axis -------------------
    m, l = pl.pallas_call(
        _stats_kernel,
        grid=(n_tiles,),
        in_specs=[
            smem, smem, smem,
            pl.BlockSpec((DIM, K, block_n), lambda t: (0, 0, t)),
            pl.BlockSpec((DIM, block_n), lambda t: (0, t)),
        ],
        out_specs=(
            pl.BlockSpec((K, 1), lambda t: (0, 0)),
            pl.BlockSpec((K, 1), lambda t: (0, 0)),
        ),
        out_shape=(jax.ShapeDtypeStruct((K, 1), jnp.float32),
                   jax.ShapeDtypeStruct((K, 1), jnp.float32)),
        scratch_shapes=[pltpu.VMEM((K, 1), jnp.float32),
                        pltpu.VMEM((K, 1), jnp.float32)],
        compiler_params=pltpu.CompilerParams(
            dimension_semantics=("arbitrary",)),
    )(nvalid, w_eff, b_eff, xknn_t, x_t)

    # ---- pass 2: x2 (flat) and attention, per-tile independent --------------
    x2_t, attn_t = pl.pallas_call(
        _gap_kernel,
        grid=(n_tiles,),
        in_specs=[
            smem, smem, smem, smem,
            pl.BlockSpec((K, 1), lambda t: (0, 0)),
            pl.BlockSpec((K, 1), lambda t: (0, 0)),
            pl.BlockSpec((DIM, K, block_n), lambda t: (0, 0, t)),
            pl.BlockSpec((DIM, block_n), lambda t: (0, t)),
        ],
        out_specs=(
            pl.BlockSpec((F * K, block_n), lambda t: (0, t)),
            pl.BlockSpec((F, block_n), lambda t: (0, t)),
        ),
        out_shape=(jax.ShapeDtypeStruct((F * K, n_pad), jnp.float32),
                   jax.ShapeDtypeStruct((F, n_pad), jnp.float32)),
        compiler_params=pltpu.CompilerParams(
            dimension_semantics=("parallel",)),
    )(w_eff, b_eff, wF, bF, m, l, xknn_t, x_t)

    # back to the PyTorch-facing layout; the flat F*K axis reinterpreted as
    # (K, F) exactly like torch's raw .reshape(N, KNN_size, F)
    x_attn = jnp.transpose(attn_t[:, :N], (1, 0))                        # (N, F)
    x2 = jnp.transpose(x2_t[:, :N], (1, 0)).reshape(N, K, F)             # (N, K, F)
    return x_attn, x2


def single_gap_ref(xknn, x, wF, bF, w1, b1):
    """Pure-JAX reference reproducing the PyTorch forward exactly."""
    N = xknn.shape[0]
    h = jnp.einsum('fd,ndk->nfk', wF, xknn) + bF[None, :, None]          # mlpF(xknn)
    a_knn = jnp.einsum('f,nfk->nk', w1, h)[:, None, :] + b1[0]           # (N,1,K)
    hx = jnp.einsum('fd,nd->nf', wF, x) + bF[None, :]                    # mlpF(x)
    s = jnp.einsum('f,nf->n', w1, hx) + b1[0]                            # (N,)
    logits = a_knn + s[:, None, None]                                    # (N,1,K)
    xc = jax.nn.softmax(logits, axis=0)                                  # legacy dim=0
    x2 = h.reshape(N, K, F)                                              # raw reshape
    attn = jnp.matmul(xc, x2)                                            # (N,1,F)
    return attn[:, 0, :], x2


if __name__ == "__main__":
    N = 200  # > one 128-lane tile: exercises the grid, online softmax and padding mask
    key = jax.random.PRNGKey(0)
    k1, k2, k3, k4, k5, k6 = jax.random.split(key, 6)

    xknn = jax.random.normal(k1, (N, DIM, K), dtype=jnp.float32)
    x = jax.random.normal(k2, (N, DIM), dtype=jnp.float32)
    # deterministic synthetic Conv1d(k=1) parameters (shapes from module __init__)
    wF = jax.random.normal(k3, (F, DIM), dtype=jnp.float32) * 0.5   # mlpF.conv.weight[:, :, 0]
    bF = jax.random.normal(k4, (F,), dtype=jnp.float32) * 0.1       # mlpF.conv.bias
    w1 = jax.random.normal(k5, (F,), dtype=jnp.float32) * 0.5       # mlp1.conv.weight[0, :, 0]
    b1 = jax.random.normal(k6, (1,), dtype=jnp.float32) * 0.1       # mlp1.conv.bias

    attn, x2 = single_gap(xknn, x, wF, bF, w1, b1)
    jax.block_until_ready((attn, x2))

    attn_ref, x2_ref = single_gap_ref(xknn, x, wF, bF, w1, b1)
    np.testing.assert_allclose(np.asarray(attn), np.asarray(attn_ref), rtol=2e-4, atol=2e-5)
    np.testing.assert_allclose(np.asarray(x2), np.asarray(x2_ref), rtol=1e-5, atol=1e-5)

    print("KERNEL_OK")
</pallas_src>

<mosaic_0001>
module attributes {stable_mosaic.version = 11 : i64} {
  func.func @_stats_kernel(%arg0: i32, %arg1: memref<1xi32, #tpu.memory_space<smem>>, %arg2: memref<3xf32, #tpu.memory_space<smem>>, %arg3: memref<1xf32, #tpu.memory_space<smem>>, %arg4: memref<3x10x128xf32, #tpu.memory_space<vmem>>, %arg5: memref<3x128xf32, #tpu.memory_space<vmem>>, %arg6: memref<10x1xf32, #tpu.memory_space<vmem>>, %arg7: memref<10x1xf32, #tpu.memory_space<vmem>>, %arg8: memref<10x1xf32, #tpu.memory_space<vmem>>, %arg9: memref<10x1xf32, #tpu.memory_space<vmem>>) attributes {dimension_semantics = [#tpu.dimension_semantics<arbitrary>], iteration_bounds = array<i64: 2>, scalar_prefetch = 0 : i64, scratch_operands = 2 : i64, tpu.core_type = #tpu.core_type<tc>, window_params = [{transform_indices = @transform_0, window_bounds = array<i64: 1>}, {transform_indices = @transform_1, window_bounds = array<i64: 3>}, {transform_indices = @transform_2, window_bounds = array<i64: 1>}, {transform_indices = @transform_3, window_bounds = array<i64: 3, 10, 128>}, {transform_indices = @transform_4, window_bounds = array<i64: 3, 128>}, {pipeline_mode = #tpu.pipeline_mode<synchronous>, transform_indices = @transform_5, window_bounds = array<i64: 10, 1>}, {pipeline_mode = #tpu.pipeline_mode<synchronous>, transform_indices = @transform_6, window_bounds = array<i64: 10, 1>}]} {
    %c0_i32 = arith.constant 0 : i32
    %0 = arith.cmpi eq, %arg0, %c0_i32 : i32
    %1 = arith.extui %0 : i1 to i32
    %c0_i32_0 = arith.constant 0 : i32
    %2 = arith.cmpi ne, %1, %c0_i32_0 : i32
    scf.if %2 {
      %cst_32 = arith.constant 0xFF800000 : f32
      %66 = vector.broadcast %cst_32 : f32 to vector<10x1xf32>
      %c0_33 = arith.constant 0 : index
      %c0_34 = arith.constant 0 : index
      %67 = vector.load %arg8[%c0_33, %c0_34] : memref<10x1xf32, #tpu.memory_space<vmem>>, vector<10x1xf32>
      tpu.vector_store %arg8[%c0_33, %c0_34], %66 {strides = array<i32>} : memref<10x1xf32, #tpu.memory_space<vmem>>, vector<10x1xf32>,
      %cst_35 = arith.constant 0.000000e+00 : f32
      %68 = vector.broadcast %cst_35 : f32 to vector<10x1xf32>
      %c0_36 = arith.constant 0 : index
      %c0_37 = arith.constant 0 : index
      %69 = vector.load %arg9[%c0_36, %c0_37] : memref<10x1xf32, #tpu.memory_space<vmem>>, vector<10x1xf32>
      tpu.vector_store %arg9[%c0_36, %c0_37], %68 {strides = array<i32>} : memref<10x1xf32, #tpu.memory_space<vmem>>, vector<10x1xf32>,
    } else {
    }
    %c0 = arith.constant 0 : index
    %3 = memref.load %arg2[%c0] : memref<3xf32, #tpu.memory_space<smem>>
    %c1 = arith.constant 1 : index
    %4 = memref.load %arg2[%c1] : memref<3xf32, #tpu.memory_space<smem>>
    %c2 = arith.constant 2 : index
    %5 = memref.load %arg2[%c2] : memref<3xf32, #tpu.memory_space<smem>>
    %c0_1 = arith.constant 0 : index
    %6 = memref.load %arg3[%c0_1] : memref<1xf32, #tpu.memory_space<smem>>
    %cst = arith.constant 2.000000e+00 : f32
    %7 = arith.mulf %cst, %6 : f32
    %c0_2 = arith.constant 0 : index
    %c0_3 = arith.constant 0 : index
    %8 = vector.load %arg5[%c0_2, %c0_3] : memref<3x128xf32, #tpu.memory_space<vmem>>, vector<1x128xf32>
    %9 = vector.broadcast %3 : f32 to vector<1x128xf32>
    %10 = arith.mulf %9, %8 : vector<1x128xf32>
    %11 = vector.broadcast %7 : f32 to vector<1x128xf32>
    %12 = arith.addf %11, %10 : vector<1x128xf32>
    %c1_4 = arith.constant 1 : index
    %c0_5 = arith.constant 0 : index
    %13 = vector.load %arg5[%c1_4, %c0_5] : memref<3x128xf32, #tpu.memory_space<vmem>>, vector<1x128xf32>
    %14 = vector.broadcast %4 : f32 to vector<1x128xf32>
    %15 = arith.mulf %14, %13 : vector<1x128xf32>
    %16 = arith.addf %12, %15 : vector<1x128xf32>
    %c2_6 = arith.constant 2 : index
    %c0_7 = arith.constant 0 : index
    %17 = vector.load %arg5[%c2_6, %c0_7] : memref<3x128xf32, #tpu.memory_space<vmem>>, vector<1x128xf32>
    %18 = vector.broadcast %5 : f32 to vector<1x128xf32>
    %19 = arith.mulf %18, %17 : vector<1x128xf32>
    %20 = arith.addf %16, %19 : vector<1x128xf32>
    %c0_8 = arith.constant 0 : index
    %c0_9 = arith.constant 0 : index
    %c0_10 = arith.constant 0 : index
    %21 = vector.load %arg4[%c0_8, %c0_9, %c0_10] : memref<3x10x128xf32, #tpu.memory_space<vmem>>, vector<1x10x128xf32>
    %22 = vector.shape_cast %21 : vector<1x10x128xf32> to vector<10x128xf32>
    %23 = vector.broadcast %3 : f32 to vector<10x128xf32>
    %24 = arith.mulf %23, %22 : vector<10x128xf32>
    %c1_11 = arith.constant 1 : index
    %c0_12 = arith.constant 0 : index
    %c0_13 = arith.constant 0 : index
    %25 = vector.load %arg4[%c1_11, %c0_12, %c0_13] : memref<3x10x128xf32, #tpu.memory_space<vmem>>, vector<1x10x128xf32>
    %26 = vector.shape_cast %25 : vector<1x10x128xf32> to vector<10x128xf32>
    %27 = vector.broadcast %4 : f32 to vector<10x128xf32>
    %28 = arith.mulf %27, %26 : vector<10x128xf32>
    %29 = arith.addf %24, %28 : vector<10x128xf32>
    %c2_14 = arith.constant 2 : index
    %c0_15 = arith.constant 0 : index
    %c0_16 = arith.constant 0 : index
    %30 = vector.load %arg4[%c2_14, %c0_15, %c0_16] : memref<3x10x128xf32, #tpu.memory_space<vmem>>, vector<1x10x128xf32>
    %31 = vector.shape_cast %30 : vector<1x10x128xf32> to vector<10x128xf32>
    %32 = vector.broadcast %5 : f32 to vector<10x128xf32>
    %33 = arith.mulf %32, %31 : vector<10x128xf32>
    %34 = arith.addf %29, %33 : vector<10x128xf32>
    %35 = vector.broadcast %20 : vector<1x128xf32> to vector<10x128xf32>
    %36 = arith.addf %34, %35 : vector<10x128xf32>
    %37 = tpu.iota {dimensions = array<i32: 1>} : vector<10x128xi32>
    %c128_i32 = arith.constant 128 : i32
    %38 = arith.muli %arg0, %c128_i32 : i32
    %39 = vector.broadcast %38 : i32 to vector<10x128xi32>
    %40 = arith.addi %39, %37 : vector<10x128xi32>
    %c0_17 = arith.constant 0 : index
    %41 = memref.load %arg1[%c0_17] : memref<1xi32, #tpu.memory_space<smem>>
    %42 = vector.broadcast %41 : i32 to vector<10x128xi32>
    %43 = arith.cmpi slt, %40, %42 : vector<10x128xi32>
    %cst_18 = arith.constant 0xFF800000 : f32
    %44 = vector.broadcast %cst_18 : f32 to vector<10x128xf32>
    %45 = arith.select %43, %36, %44 : vector<10x128xi1>, vector<10x128xf32>
    %cst_19 = arith.constant dense<0xFF800000> : vector<10xf32>
    %46 = vector.multi_reduction <maximumf>, %45, %cst_19 [1] : vector<10x128xf32> to vector<10xf32>
    %47 = vector.shape_cast %46 : vector<10xf32> to vector<10x1xf32>
    %c0_20 = arith.constant 0 : index
    %c0_21 = arith.constant 0 : index
    %48 = vector.load %arg8[%c0_20, %c0_21] : memref<10x1xf32, #tpu.memory_space<vmem>>, vector<10x1xf32>
    %49 = arith.maximumf %48, %47 : vector<10x1xf32>
    %c0_22 = arith.constant 0 : index
    %c0_23 = arith.constant 0 : index
    %50 = vector.load %arg8[%c0_22, %c0_23] : memref<10x1xf32, #tpu.memory_space<vmem>>, vector<10x1xf32>
    %51 = arith.subf %50, %49 : vector<10x1xf32>
    %52 = math.exp %51 : vector<10x1xf32>
    %53 = vector.broadcast %49 : vector<10x1xf32> to vector<10x128xf32>
    %54 = arith.subf %45, %53 : vector<10x128xf32>
    %55 = math.exp %54 : vector<10x128xf32>
    %c0_24 = arith.constant 0 : index
    %c0_25 = arith.constant 0 : index
    %56 = vector.load %arg9[%c0_24, %c0_25] : memref<10x1xf32, #tpu.memory_space<vmem>>, vector<10x1xf32>
    %57 = arith.mulf %52, %56 : vector<10x1xf32>
    %cst_26 = arith.constant dense<0.000000e+00> : vector<10xf32>
    %58 = vector.multi_reduction <add>, %55, %cst_26 [1] : vector<10x128xf32> to vector<10xf32>
    %59 = vector.shape_cast %58 : vector<10xf32> to vector<10x1xf32>
    %60 = arith.addf %57, %59 : vector<10x1xf32>
    %c0_27 = arith.constant 0 : index
    %c0_28 = arith.constant 0 : index
    %61 = vector.load %arg9[%c0_27, %c0_28] : memref<10x1xf32, #tpu.memory_space<vmem>>, vector<10x1xf32>
    tpu.vector_store %arg9[%c0_27, %c0_28], %60 {strides = array<i32>} : memref<10x1xf32, #tpu.memory_space<vmem>>, vector<10x1xf32>,
    %c0_29 = arith.constant 0 : index
    %c0_30 = arith.constant 0 : index
    %62 = vector.load %arg8[%c0_29, %c0_30] : memref<10x1xf32, #tpu.memory_space<vmem>>, vector<10x1xf32>
    tpu.vector_store %arg8[%c0_29, %c0_30], %49 {strides = array<i32>} : memref<10x1xf32, #tpu.memory_space<vmem>>, vector<10x1xf32>,
    %c1_i32 = arith.constant 1 : i32
    %63 = arith.cmpi eq, %arg0, %c1_i32 : i32
    %64 = arith.extui %63 : i1 to i32
    %c0_i32_31 = arith.constant 0 : i32
    %65 = arith.cmpi ne, %64, %c0_i32_31 : i32
    scf.if %65 {
      %c0_32 = arith.constant 0 : index
      %c0_33 = arith.constant 0 : index
      %66 = vector.load %arg8[%c0_32, %c0_33] : memref<10x1xf32, #tpu.memory_space<vmem>>, vector<10x1xf32>
      %c0_34 = arith.constant 0 : index
      %c0_35 = arith.constant 0 : index
      %67 = vector.load %arg6[%c0_34, %c0_35] : memref<10x1xf32, #tpu.memory_space<vmem>>, vector<10x1xf32>
      tpu.vector_store %arg6[%c0_34, %c0_35], %66 {strides = array<i32>} : memref<10x1xf32, #tpu.memory_space<vmem>>, vector<10x1xf32>,
      %c0_36 = arith.constant 0 : index
      %c0_37 = arith.constant 0 : index
      %68 = vector.load %arg9[%c0_36, %c0_37] : memref<10x1xf32, #tpu.memory_space<vmem>>, vector<10x1xf32>
      %c0_38 = arith.constant 0 : index
      %c0_39 = arith.constant 0 : index
      %69 = vector.load %arg7[%c0_38, %c0_39] : memref<10x1xf32, #tpu.memory_space<vmem>>, vector<10x1xf32>
      tpu.vector_store %arg7[%c0_38, %c0_39], %68 {strides = array<i32>} : memref<10x1xf32, #tpu.memory_space<vmem>>, vector<10x1xf32>,
    } else {
    }
    return
  }
  func.func @transform_0(%arg0: i32) -> i32 {
    %c0_i32 = arith.constant 0 : i32
    %c0_i32_0 = arith.constant 0 : i32
    return %c0_i32 : i32
  }
  func.func @transform_1(%arg0: i32) -> i32 {
    %c0_i32 = arith.constant 0 : i32
    %c0_i32_0 = arith.constant 0 : i32
    return %c0_i32 : i32
  }
  func.func @transform_2(%arg0: i32) -> i32 {
    %c0_i32 = arith.constant 0 : i32
    %c0_i32_0 = arith.constant 0 : i32
    return %c0_i32 : i32
  }
  func.func @transform_3(%arg0: i32) -> (i32, i32, i32) {
    %c0_i32 = arith.constant 0 : i32
    %c0_i32_0 = arith.constant 0 : i32
    %c0_i32_1 = arith.constant 0 : i32
    return %c0_i32, %c0_i32_0, %arg0 : i32, i32, i32
  }
  func.func @transform_4(%arg0: i32) -> (i32, i32) {
    %c0_i32 = arith.constant 0 : i32
    %c0_i32_0 = arith.constant 0 : i32
    return %c0_i32, %arg0 : i32, i32
  }
  func.func @transform_5(%arg0: i32) -> (i32, i32) {
    %c0_i32 = arith.constant 0 : i32
    %c0_i32_0 = arith.constant 0 : i32
    %c0_i32_1 = arith.constant 0 : i32
    return %c0_i32, %c0_i32_0 : i32, i32
  }
  func.func @transform_6(%arg0: i32) -> (i32, i32) {
    %c0_i32 = arith.constant 0 : i32
    %c0_i32_0 = arith.constant 0 : i32
    %c0_i32_1 = arith.constant 0 : i32
    return %c0_i32, %c0_i32_0 : i32, i32
  }
}

module attributes {stable_mosaic.version = 11 : i64} {
  func.func @_gap_kernel(%arg0: i32, %arg1: memref<3xf32, #tpu.memory_space<smem>>, %arg2: memref<1xf32, #tpu.memory_space<smem>>, %arg3: memref<16x3xf32, #tpu.memory_space<smem>>, %arg4: memref<16xf32, #tpu.memory_space<smem>>, %arg5: memref<10x1xf32, #tpu.memory_space<vmem>>, %arg6: memref<10x1xf32, #tpu.memory_space<vmem>>, %arg7: memref<3x10x128xf32, #tpu.memory_space<vmem>>, %arg8: memref<3x128xf32, #tpu.memory_space<vmem>>, %arg9: memref<160x128xf32, #tpu.memory_space<vmem>>, %arg10: memref<16x128xf32, #tpu.memory_space<vmem>>) attributes {dimension_semantics = [#tpu.dimension_semantics<parallel>], iteration_bounds = array<i64: 2>, scalar_prefetch = 0 : i64, scratch_operands = 0 : i64, tpu.core_type = #tpu.core_type<tc>, window_params = [{transform_indices = @transform_0, window_bounds = array<i64: 3>}, {transform_indices = @transform_1, window_bounds = array<i64: 1>}, {transform_indices = @transform_2, window_bounds = array<i64: 16, 3>}, {transform_indices = @transform_3, window_bounds = array<i64: 16>}, {pipeline_mode = #tpu.pipeline_mode<synchronous>, transform_indices = @transform_4, window_bounds = array<i64: 10, 1>}, {pipeline_mode = #tpu.pipeline_mode<synchronous>, transform_indices = @transform_5, window_bounds = array<i64: 10, 1>}, {transform_indices = @transform_6, window_bounds = array<i64: 3, 10, 128>}, {transform_indices = @transform_7, window_bounds = array<i64: 3, 128>}, {transform_indices = @transform_8, window_bounds = array<i64: 160, 128>}, {transform_indices = @transform_9, window_bounds = array<i64: 16, 128>}]} {
    %c0 = arith.constant 0 : index
    %0 = memref.load %arg1[%c0] : memref<3xf32, #tpu.memory_space<smem>>
    %c1 = arith.constant 1 : index
    %1 = memref.load %arg1[%c1] : memref<3xf32, #tpu.memory_space<smem>>
    %c2 = arith.constant 2 : index
    %2 = memref.load %arg1[%c2] : memref<3xf32, #tpu.memory_space<smem>>
    %c0_0 = arith.constant 0 : index
    %3 = memref.load %arg2[%c0_0] : memref<1xf32, #tpu.memory_space<smem>>
    %c0_1 = arith.constant 0 : index
    %c0_2 = arith.constant 0 : index
    %c0_3 = arith.constant 0 : index
    %4 = vector.load %arg7[%c0_1, %c0_2, %c0_3] : memref<3x10x128xf32, #tpu.memory_space<vmem>>, vector<1x10x128xf32>
    %5 = vector.shape_cast %4 : vector<1x10x128xf32> to vector<10x128xf32>
    %c1_4 = arith.constant 1 : index
    %c0_5 = arith.constant 0 : index
    %c0_6 = arith.constant 0 : index
    %6 = vector.load %arg7[%c1_4, %c0_5, %c0_6] : memref<3x10x128xf32, #tpu.memory_space<vmem>>, vector<1x10x128xf32>
    %7 = vector.shape_cast %6 : vector<1x10x128xf32> to vector<10x128xf32>
    %c2_7 = arith.constant 2 : index
    %c0_8 = arith.constant 0 : index
    %c0_9 = arith.constant 0 : index
    %8 = vector.load %arg7[%c2_7, %c0_8, %c0_9] : memref<3x10x128xf32, #tpu.memory_space<vmem>>, vector<1x10x128xf32>
    %9 = vector.shape_cast %8 : vector<1x10x128xf32> to vector<10x128xf32>
    %cst = arith.constant 2.000000e+00 : f32
    %10 = arith.mulf %cst, %3 : f32
    %c0_10 = arith.constant 0 : index
    %c0_11 = arith.constant 0 : index
    %11 = vector.load %arg8[%c0_10, %c0_11] : memref<3x128xf32, #tpu.memory_space<vmem>>, vector<1x128xf32>
    %12 = vector.broadcast %0 : f32 to vector<1x128xf32>
    %13 = arith.mulf %12, %11 : vector<1x128xf32>
    %14 = vector.broadcast %10 : f32 to vector<1x128xf32>
    %15 = arith.addf %14, %13 : vector<1x128xf32>
    %c1_12 = arith.constant 1 : index
    %c0_13 = arith.constant 0 : index
    %16 = vector.load %arg8[%c1_12, %c0_13] : memref<3x128xf32, #tpu.memory_space<vmem>>, vector<1x128xf32>
    %17 = vector.broadcast %1 : f32 to vector<1x128xf32>
    %18 = arith.mulf %17, %16 : vector<1x128xf32>
    %19 = arith.addf %15, %18 : vector<1x128xf32>
    %c2_14 = arith.constant 2 : index
    %c0_15 = arith.constant 0 : index
    %20 = vector.load %arg8[%c2_14, %c0_15] : memref<3x128xf32, #tpu.memory_space<vmem>>, vector<1x128xf32>
    %21 = vector.broadcast %2 : f32 to vector<1x128xf32>
    %22 = arith.mulf %21, %20 : vector<1x128xf32>
    %23 = arith.addf %19, %22 : vector<1x128xf32>
    %24 = vector.broadcast %0 : f32 to vector<10x128xf32>
    %25 = arith.mulf %24, %5 : vector<10x128xf32>
    %26 = vector.broadcast %1 : f32 to vector<10x128xf32>
    %27 = arith.mulf %26, %7 : vector<10x128xf32>
    %28 = arith.addf %25, %27 : vector<10x128xf32>
    %29 = vector.broadcast %2 : f32 to vector<10x128xf32>
    %30 = arith.mulf %29, %9 : vector<10x128xf32>
    %31 = arith.addf %28, %30 : vector<10x128xf32>
    %32 = vector.broadcast %23 : vector<1x128xf32> to vector<10x128xf32>
    %33 = arith.addf %31, %32 : vector<10x128xf32>
    %c0_16 = arith.constant 0 : index
    %c0_17 = arith.constant 0 : index
    %34 = vector.load %arg5[%c0_16, %c0_17] : memref<10x1xf32, #tpu.memory_space<vmem>>, vector<10x1xf32>
    %35 = vector.broadcast %34 : vector<10x1xf32> to vector<10x128xf32>
    %36 = arith.subf %33, %35 : vector<10x128xf32>
    %37 = math.exp %36 : vector<10x128xf32>
    %c0_18 = arith.constant 0 : index
    %c0_19 = arith.constant 0 : index
    %38 = vector.load %arg6[%c0_18, %c0_19] : memref<10x1xf32, #tpu.memory_space<vmem>>, vector<10x1xf32>
    %39 = vector.broadcast %38 : vector<10x1xf32> to vector<10x128xf32>
    %40 = arith.divf %37, %39 : vector<10x128xf32>
    %c0_20 = arith.constant 0 : index
    %41 = memref.load %arg4[%c0_20] : memref<16xf32, #tpu.memory_space<smem>>
    %c0_21 = arith.constant 0 : index
    %c0_22 = arith.constant 0 : index
    %42 = memref.load %arg3[%c0_21, %c0_22] : memref<16x3xf32, #tpu.memory_space<smem>>
    %43 = vector.broadcast %42 : f32 to vector<10x128xf32>
    %44 = arith.mulf %43, %5 : vector<10x128xf32>
    %45 = vector.broadcast %41 : f32 to vector<10x128xf32>
    %46 = arith.addf %45, %44 : vector<10x128xf32>
    %c0_23 = arith.constant 0 : index
    %c1_24 = arith.constant 1 : index
    %47 = memref.load %arg3[%c0_23, %c1_24] : memref<16x3xf32, #tpu.memory_space<smem>>
    %48 = vector.broadcast %47 : f32 to vector<10x128xf32>
    %49 = arith.mulf %48, %7 : vector<10x128xf32>
    %50 = arith.addf %46, %49 : vector<10x128xf32>
    %c0_25 = arith.constant 0 : index
    %c2_26 = arith.constant 2 : index
    %51 = memref.load %arg3[%c0_25, %c2_26] : memref<16x3xf32, #tpu.memory_space<smem>>
    %52 = vector.broadcast %51 : f32 to vector<10x128xf32>
    %53 = arith.mulf %52, %9 : vector<10x128xf32>
    %54 = arith.addf %50, %53 : vector<10x128xf32>
    %c0_27 = arith.constant 0 : index
    %c0_28 = arith.constant 0 : index
    %55 = vector.load %arg9[%c0_27, %c0_28] : memref<160x128xf32, #tpu.memory_space<vmem>>, vector<10x128xf32>
    tpu.vector_store %arg9[%c0_27, %c0_28], %54 {strides = array<i32>} : memref<160x128xf32, #tpu.memory_space<vmem>>, vector<10x128xf32>,
    %c1_29 = arith.constant 1 : index
    %56 = memref.load %arg4[%c1_29] : memref<16xf32, #tpu.memory_space<smem>>
    %c1_30 = arith.constant 1 : index
    %c0_31 = arith.constant 0 : index
    %57 = memref.load %arg3[%c1_30, %c0_31] : memref<16x3xf32, #tpu.memory_space<smem>>
    %58 = vector.broadcast %57 : f32 to vector<10x128xf32>
    %59 = arith.mulf %58, %5 : vector<10x128xf32>
    %60 = vector.broadcast %56 : f32 to vector<10x128xf32>
    %61 = arith.addf %60, %59 : vector<10x128xf32>
    %c1_32 = arith.constant 1 : index
    %c1_33 = arith.constant 1 : index
    %62 = memref.load %arg3[%c1_32, %c1_33] : memref<16x3xf32, #tpu.memory_space<smem>>
    %63 = vector.broadcast %62 : f32 to vector<10x128xf32>
    %64 = arith.mulf %63, %7 : vector<10x128xf32>
    %65 = arith.addf %61, %64 : vector<10x128xf32>
    %c1_34 = arith.constant 1 : index
    %c2_35 = arith.constant 2 : index
    %66 = memref.load %arg3[%c1_34, %c2_35] : memref<16x3xf32, #tpu.memory_space<smem>>
    %67 = vector.broadcast %66 : f32 to vector<10x128xf32>
    %68 = arith.mulf %67, %9 : vector<10x128xf32>
    %69 = arith.addf %65, %68 : vector<10x128xf32>
    %c10 = arith.constant 10 : index
    %c0_36 = arith.constant 0 : index
    %70 = vector.load %arg9[%c10, %c0_36] : memref<160x128xf32, #tpu.memory_space<vmem>>, vector<10x128xf32>
    tpu.vector_store %arg9[%c10, %c0_36], %69 {strides = array<i32>} : memref<160x128xf32, #tpu.memory_space<vmem>>, vector<10x128xf32>,
    %c2_37 = arith.constant 2 : index
    %71 = memref.load %arg4[%c2_37] : memref<16xf32, #tpu.memory_space<smem>>
    %c2_38 = arith.constant 2 : index
    %c0_39 = arith.constant 0 : index
    %72 = memref.load %arg3[%c2_38, %c0_39] : memref<16x3xf32, #tpu.memory_space<smem>>
    %73 = vector.broadcast %72 : f32 to vector<10x128xf32>
    %74 = arith.mulf %73, %5 : vector<10x128xf32>
    %75 = vector.broadcast %71 : f32 to vector<10x128xf32>
    %76 = arith.addf %75, %74 : vector<10x128xf32>
    %c2_40 = arith.constant 2 : index
    %c1_41 = arith.constant 1 : index
    %77 = memref.load %arg3[%c2_40, %c1_41] : memref<16x3xf32, #tpu.memory_space<smem>>
    %78 = vector.broadcast %77 : f32 to vector<10x128xf32>
    %79 = arith.mulf %78, %7 : vector<10x128xf32>
    %80 = arith.addf %76, %79 : vector<10x128xf32>
    %c2_42 = arith.constant 2 : index
    %c2_43 = arith.constant 2 : index
    %81 = memref.load %arg3[%c2_42, %c2_43] : memref<16x3xf32, #tpu.memory_space<smem>>
    %82 = vector.broadcast %81 : f32 to vector<10x128xf32>
    %83 = arith.mulf %82, %9 : vector<10x128xf32>
    %84 = arith.addf %80, %83 : vector<10x128xf32>
    %c20 = arith.constant 20 : index
    %c0_44 = arith.constant 0 : index
    %85 = vector.load %arg9[%c20, %c0_44] : memref<160x128xf32, #tpu.memory_space<vmem>>, vector<10x128xf32>
    tpu.vector_store %arg9[%c20, %c0_44], %84 {strides = array<i32>} : memref<160x128xf32, #tpu.memory_space<vmem>>, vector<10x128xf32>,
    %c3 = arith.constant 3 : index
    %86 = memref.load %arg4[%c3] : memref<16xf32, #tpu.memory_space<smem>>
    %c3_45 = arith.constant 3 : index
    %c0_46 = arith.constant 0 : index
    %87 = memref.load %arg3[%c3_45, %c0_46] : memref<16x3xf32, #tpu.memory_space<smem>>
    %88 = vector.broadcast %87 : f32 to vector<10x128xf32>
    %89 = arith.mulf %88, %5 : vector<10x128xf32>
    %90 = vector.broadcast %86 : f32 to vector<10x128xf32>
    %91 = arith.addf %90, %89 : vector<10x128xf32>
    %c3_47 = arith.constant 3 : index
    %c1_48 = arith.constant 1 : index
    %92 = memref.load %arg3[%c3_47, %c1_48] : memref<16x3xf32, #tpu.memory_space<smem>>
    %93 = vector.broadcast %92 : f32 to vector<10x128xf32>
    %94 = arith.mulf %93, %7 : vector<10x128xf32>
    %95 = arith.addf %91, %94 : vector<10x128xf32>
    %c3_49 = arith.constant 3 : index
    %c2_50 = arith.constant 2 : index
    %96 = memref.load %arg3[%c3_49, %c2_50] : memref<16x3xf32, #tpu.memory_space<smem>>
    %97 = vector.broadcast %96 : f32 to vector<10x128xf32>
    %98 = arith.mulf %97, %9 : vector<10x128xf32>
    %99 = arith.addf %95, %98 : vector<10x128xf32>
    %c30 = arith.constant 30 : index
    %c0_51 = arith.constant 0 : index
    %100 = vector.load %arg9[%c30, %c0_51] : memref<160x128xf32, #tpu.memory_space<vmem>>, vector<10x128xf32>
    tpu.vector_store %arg9[%c30, %c0_51], %99 {strides = array<i32>} : memref<160x128xf32, #tpu.memory_space<vmem>>, vector<10x128xf32>,
    %c4 = arith.constant 4 : index
    %101 = memref.load %arg4[%c4] : memref<16xf32, #tpu.memory_space<smem>>
    %c4_52 = arith.constant 4 : index
    %c0_53 = arith.constant 0 : index
    %102 = memref.load %arg3[%c4_52, %c0_53] : memref<16x3xf32, #tpu.memory_space<smem>>
    %103 = vector.broadcast %102 : f32 to vector<10x128xf32>
    %104 = arith.mulf %103, %5 : vector<10x128xf32>
    %105 = vector.broadcast %101 : f32 to vector<10x128xf32>
    %106 = arith.addf %105, %104 : vector<10x128xf32>
    %c4_54 = arith.constant 4 : index
    %c1_55 = arith.constant 1 : index
    %107 = memref.load %arg3[%c4_54, %c1_55] : memref<16x3xf32, #tpu.memory_space<smem>>
    %108 = vector.broadcast %107 : f32 to vector<10x128xf32>
    %109 = arith.mulf %108, %7 : vector<10x128xf32>
    %110 = arith.addf %106, %109 : vector<10x128xf32>
    %c4_56 = arith.constant 4 : index
    %c2_57 = arith.constant 2 : index
    %111 = memref.load %arg3[%c4_56, %c2_57] : memref<16x3xf32, #tpu.memory_space<smem>>
    %112 = vector.broadcast %111 : f32 to vector<10x128xf32>
    %113 = arith.mulf %112, %9 : vector<10x128xf32>
    %114 = arith.addf %110, %113 : vector<10x128xf32>
    %c40 = arith.constant 40 : index
    %c0_58 = arith.constant 0 : index
    %115 = vector.load %arg9[%c40, %c0_58] : memref<160x128xf32, #tpu.memory_space<vmem>>, vector<10x128xf32>
    tpu.vector_store %arg9[%c40, %c0_58], %114 {strides = array<i32>} : memref<160x128xf32, #tpu.memory_space<vmem>>, vector<10x128xf32>,
    %c5 = arith.constant 5 : index
    %116 = memref.load %arg4[%c5] : memref<16xf32, #tpu.memory_space<smem>>
    %c5_59 = arith.constant 5 : index
    %c0_60 = arith.constant 0 : index
    %117 = memref.load %arg3[%c5_59, %c0_60] : memref<16x3xf32, #tpu.memory_space<smem>>
    %118 = vector.broadcast %117 : f32 to vector<10x128xf32>
    %119 = arith.mulf %118, %5 : vector<10x128xf32>
    %120 = vector.broadcast %116 : f32 to vector<10x128xf32>
    %121 = arith.addf %120, %119 : vector<10x128xf32>
    %c5_61 = arith.constant 5 : index
    %c1_62 = arith.constant 1 : index
    %122 = memref.load %arg3[%c5_61, %c1_62] : memref<16x3xf32, #tpu.memory_space<smem>>
    %123 = vector.broadcast %122 : f32 to vector<10x128xf32>
    %124 = arith.mulf %123, %7 : vector<10x128xf32>
    %125 = arith.addf %121, %124 : vector<10x128xf32>
    %c5_63 = arith.constant 5 : index
    %c2_64 = arith.constant 2 : index
    %126 = memref.load %arg3[%c5_63, %c2_64] : memref<16x3xf32, #tpu.memory_space<smem>>
    %127 = vector.broadcast %126 : f32 to vector<10x128xf32>
    %128 = arith.mulf %127, %9 : vector<10x128xf32>
    %129 = arith.addf %125, %128 : vector<10x128xf32>
    %c50 = arith.constant 50 : index
    %c0_65 = arith.constant 0 : index
    %130 = vector.load %arg9[%c50, %c0_65] : memref<160x128xf32, #tpu.memory_space<vmem>>, vector<10x128xf32>
    tpu.vector_store %arg9[%c50, %c0_65], %129 {strides = array<i32>} : memref<160x128xf32, #tpu.memory_space<vmem>>, vector<10x128xf32>,
    %c6 = arith.constant 6 : index
    %131 = memref.load %arg4[%c6] : memref<16xf32, #tpu.memory_space<smem>>
    %c6_66 = arith.constant 6 : index
    %c0_67 = arith.constant 0 : index
    %132 = memref.load %arg3[%c6_66, %c0_67] : memref<16x3xf32, #tpu.memory_space<smem>>
    %133 = vector.broadcast %132 : f32 to vector<10x128xf32>
    %134 = arith.mulf %133, %5 : vector<10x128xf32>
    %135 = vector.broadcast %131 : f32 to vector<10x128xf32>
    %136 = arith.addf %135, %134 : vector<10x128xf32>
    %c6_68 = arith.constant 6 : index
    %c1_69 = arith.constant 1 : index
    %137 = memref.load %arg3[%c6_68, %c1_69] : memref<16x3xf32, #tpu.memory_space<smem>>
    %138 = vector.broadcast %137 : f32 to vector<10x128xf32>
    %139 = arith.mulf %138, %7 : vector<10x128xf32>
    %140 = arith.addf %136, %139 : vector<10x128xf32>
    %c6_70 = arith.constant 6 : index
    %c2_71 = arith.constant 2 : index
    %141 = memref.load %arg3[%c6_70, %c2_71] : memref<16x3xf32, #tpu.memory_space<smem>>
    %142 = vector.broadcast %141 : f32 to vector<10x128xf32>
    %143 = arith.mulf %142, %9 : vector<10x128xf32>
    %144 = arith.addf %140, %143 : vector<10x128xf32>
    %c60 = arith.constant 60 : index
    %c0_72 = arith.constant 0 : index
    %145 = vector.load %arg9[%c60, %c0_72] : memref<160x128xf32, #tpu.memory_space<vmem>>, vector<10x128xf32>
    tpu.vector_store %arg9[%c60, %c0_72], %144 {strides = array<i32>} : memref<160x128xf32, #tpu.memory_space<vmem>>, vector<10x128xf32>,
    %c7 = arith.constant 7 : index
    %146 = memref.load %arg4[%c7] : memref<16xf32, #tpu.memory_space<smem>>
    %c7_73 = arith.constant 7 : index
    %c0_74 = arith.constant 0 : index
    %147 = memref.load %arg3[%c7_73, %c0_74] : memref<16x3xf32, #tpu.memory_space<smem>>
    %148 = vector.broadcast %147 : f32 to vector<10x128xf32>
    %149 = arith.mulf %148, %5 : vector<10x128xf32>
    %150 = vector.broadcast %146 : f32 to vector<10x128xf32>
    %151 = arith.addf %150, %149 : vector<10x128xf32>
    %c7_75 = arith.constant 7 : index
    %c1_76 = arith.constant 1 : index
    %152 = memref.load %arg3[%c7_75, %c1_76] : memref<16x3xf32, #tpu.memory_space<smem>>
    %153 = vector.broadcast %152 : f32 to vector<10x128xf32>
    %154 = arith.mulf %153, %7 : vector<10x128xf32>
    %155 = arith.addf %151, %154 : vector<10x128xf32>
    %c7_77 = arith.constant 7 : index
    %c2_78 = arith.constant 2 : index
    %156 = memref.load %arg3[%c7_77, %c2_78] : memref<16x3xf32, #tpu.memory_space<smem>>
    %157 = vector.broadcast %156 : f32 to vector<10x128xf32>
    %158 = arith.mulf %157, %9 : vector<10x128xf32>
    %159 = arith.addf %155, %158 : vector<10x128xf32>
    %c70 = arith.constant 70 : index
    %c0_79 = arith.constant 0 : index
    %160 = vector.load %arg9[%c70, %c0_79] : memref<160x128xf32, #tpu.memory_space<vmem>>, vector<10x128xf32>
    tpu.vector_store %arg9[%c70, %c0_79], %159 {strides = array<i32>} : memref<160x128xf32, #tpu.memory_space<vmem>>, vector<10x128xf32>,
    %c8 = arith.constant 8 : index
    %161 = memref.load %arg4[%c8] : memref<16xf32, #tpu.memory_space<smem>>
    %c8_80 = arith.constant 8 : index
    %c0_81 = arith.constant 0 : index
    %162 = memref.load %arg3[%c8_80, %c0_81] : memref<16x3xf32, #tpu.memory_space<smem>>
    %163 = vector.broadcast %162 : f32 to vector<10x128xf32>
    %164 = arith.mulf %163, %5 : vector<10x128xf32>
    %165 = vector.broadcast %161 : f32 to vector<10x128xf32>
    %166 = arith.addf %165, %164 : vector<10x128xf32>
    %c8_82 = arith.constant 8 : index
    %c1_83 = arith.constant 1 : index
    %167 = memref.load %arg3[%c8_82, %c1_83] : memref<16x3xf32, #tpu.memory_space<smem>>
    %168 = vector.broadcast %167 : f32 to vector<10x128xf32>
    %169 = arith.mulf %168, %7 : vector<10x128xf32>
    %170 = arith.addf %166, %169 : vector<10x128xf32>
    %c8_84 = arith.constant 8 : index
    %c2_85 = arith.constant 2 : index
    %171 = memref.load %arg3[%c8_84, %c2_85] : memref<16x3xf32, #tpu.memory_space<smem>>
    %172 = vector.broadcast %171 : f32 to vector<10x128xf32>
    %173 = arith.mulf %172, %9 : vector<10x128xf32>
    %174 = arith.addf %170, %173 : vector<10x128xf32>
    %c80 = arith.constant 80 : index
    %c0_86 = arith.constant 0 : index
    %175 = vector.load %arg9[%c80, %c0_86] : memref<160x128xf32, #tpu.memory_space<vmem>>, vector<10x128xf32>
    tpu.vector_store %arg9[%c80, %c0_86], %174 {strides = array<i32>} : memref<160x128xf32, #tpu.memory_space<vmem>>, vector<10x128xf32>,
    %c9 = arith.constant 9 : index
    %176 = memref.load %arg4[%c9] : memref<16xf32, #tpu.memory_space<smem>>
    %c9_87 = arith.constant 9 : index
    %c0_88 = arith.constant 0 : index
    %177 = memref.load %arg3[%c9_87, %c0_88] : memref<16x3xf32, #tpu.memory_space<smem>>
    %178 = vector.broadcast %177 : f32 to vector<10x128xf32>
    %179 = arith.mulf %178, %5 : vector<10x128xf32>
    %180 = vector.broadcast %176 : f32 to vector<10x128xf32>
    %181 = arith.addf %180, %179 : vector<10x128xf32>
    %c9_89 = arith.constant 9 : index
    %c1_90 = arith.constant 1 : index
    %182 = memref.load %arg3[%c9_89, %c1_90] : memref<16x3xf32, #tpu.memory_space<smem>>
    %183 = vector.broadcast %182 : f32 to vector<10x128xf32>
    %184 = arith.mulf %183, %7 : vector<10x128xf32>
    %185 = arith.addf %181, %184 : vector<10x128xf32>
    %c9_91 = arith.constant 9 : index
    %c2_92 = arith.constant 2 : index
    %186 = memref.load %arg3[%c9_91, %c2_92] : memref<16x3xf32, #tpu.memory_space<smem>>
    %187 = vector.broadcast %186 : f32 to vector<10x128xf32>
    %188 = arith.mulf %187, %9 : vector<10x128xf32>
    %189 = arith.addf %185, %188 : vector<10x128xf32>
    %c90 = arith.constant 90 : index
    %c0_93 = arith.constant 0 : index
    %190 = vector.load %arg9[%c90, %c0_93] : memref<160x128xf32, #tpu.memory_space<vmem>>, vector<10x128xf32>
    tpu.vector_store %arg9[%c90, %c0_93], %189 {strides = array<i32>} : memref<160x128xf32, #tpu.memory_space<vmem>>, vector<10x128xf32>,
    %c10_94 = arith.constant 10 : index
    %191 = memref.load %arg4[%c10_94] : memref<16xf32, #tpu.memory_space<smem>>
    %c10_95 = arith.constant 10 : index
    %c0_96 = arith.constant 0 : index
    %192 = memref.load %arg3[%c10_95, %c0_96] : memref<16x3xf32, #tpu.memory_space<smem>>
    %193 = vector.broadcast %192 : f32 to vector<10x128xf32>
    %194 = arith.mulf %193, %5 : vector<10x128xf32>
    %195 = vector.broadcast %191 : f32 to vector<10x128xf32>
    %196 = arith.addf %195, %194 : vector<10x128xf32>
    %c10_97 = arith.constant 10 : index
    %c1_98 = arith.constant 1 : index
    %197 = memref.load %arg3[%c10_97, %c1_98] : memref<16x3xf32, #tpu.memory_space<smem>>
    %198 = vector.broadcast %197 : f32 to vector<10x128xf32>
    %199 = arith.mulf %198, %7 : vector<10x128xf32>
    %200 = arith.addf %196, %199 : vector<10x128xf32>
    %c10_99 = arith.constant 10 : index
    %c2_100 = arith.constant 2 : index
    %201 = memref.load %arg3[%c10_99, %c2_100] : memref<16x3xf32, #tpu.memory_space<smem>>
    %202 = vector.broadcast %201 : f32 to vector<10x128xf32>
    %203 = arith.mulf %202, %9 : vector<10x128xf32>
    %204 = arith.addf %200, %203 : vector<10x128xf32>
    %c100 = arith.constant 100 : index
    %c0_101 = arith.constant 0 : index
    %205 = vector.load %arg9[%c100, %c0_101] : memref<160x128xf32, #tpu.memory_space<vmem>>, vector<10x128xf32>
    tpu.vector_store %arg9[%c100, %c0_101], %204 {strides = array<i32>} : memref<160x128xf32, #tpu.memory_space<vmem>>, vector<10x128xf32>,
    %c11 = arith.constant 11 : index
    %206 = memref.load %arg4[%c11] : memref<16xf32, #tpu.memory_space<smem>>
    %c11_102 = arith.constant 11 : index
    %c0_103 = arith.constant 0 : index
    %207 = memref.load %arg3[%c11_102, %c0_103] : memref<16x3xf32, #tpu.memory_space<smem>>
    %208 = vector.broadcast %207 : f32 to vector<10x128xf32>
    %209 = arith.mulf %208, %5 : vector<10x128xf32>
    %210 = vector.broadcast %206 : f32 to vector<10x128xf32>
    %211 = arith.addf %210, %209 : vector<10x128xf32>
    %c11_104 = arith.constant 11 : index
    %c1_105 = arith.constant 1 : index
    %212 = memref.load %arg3[%c11_104, %c1_105] : memref<16x3xf32, #tpu.memory_space<smem>>
    %213 = vector.broadcast %212 : f32 to vector<10x128xf32>
    %214 = arith.mulf %213, %7 : vector<10x128xf32>
    %215 = arith.addf %211, %214 : vector<10x128xf32>
    %c11_106 = arith.constant 11 : index
    %c2_107 = arith.constant 2 : index
    %216 = memref.load %arg3[%c11_106, %c2_107] : memref<16x3xf32, #tpu.memory_space<smem>>
    %217 = vector.broadcast %216 : f32 to vector<10x128xf32>
    %218 = arith.mulf %217, %9 : vector<10x128xf32>
    %219 = arith.addf %215, %218 : vector<10x128xf32>
    %c110 = arith.constant 110 : index
    %c0_108 = arith.constant 0 : index
    %220 = vector.load %arg9[%c110, %c0_108] : memref<160x128xf32, #tpu.memory_space<vmem>>, vector<10x128xf32>
    tpu.vector_store %arg9[%c110, %c0_108], %219 {strides = array<i32>} : memref<160x128xf32, #tpu.memory_space<vmem>>, vector<10x128xf32>,
    %c12 = arith.constant 12 : index
    %221 = memref.load %arg4[%c12] : memref<16xf32, #tpu.memory_space<smem>>
    %c12_109 = arith.constant 12 : index
    %c0_110 = arith.constant 0 : index
    %222 = memref.load %arg3[%c12_109, %c0_110] : memref<16x3xf32, #tpu.memory_space<smem>>
    %223 = vector.broadcast %222 : f32 to vector<10x128xf32>
    %224 = arith.mulf %223, %5 : vector<10x128xf32>
    %225 = vector.broadcast %221 : f32 to vector<10x128xf32>
    %226 = arith.addf %225, %224 : vector<10x128xf32>
    %c12_111 = arith.constant 12 : index
    %c1_112 = arith.constant 1 : index
    %227 = memref.load %arg3[%c12_111, %c1_112] : memref<16x3xf32, #tpu.memory_space<smem>>
    %228 = vector.broadcast %227 : f32 to vector<10x128xf32>
    %229 = arith.mulf %228, %7 : vector<10x128xf32>
    %230 = arith.addf %226, %229 : vector<10x128xf32>
    %c12_113 = arith.constant 12 : index
    %c2_114 = arith.constant 2 : index
    %231 = memref.load %arg3[%c12_113, %c2_114] : memref<16x3xf32, #tpu.memory_space<smem>>
    %232 = vector.broadcast %231 : f32 to vector<10x128xf32>
    %233 = arith.mulf %232, %9 : vector<10x128xf32>
    %234 = arith.addf %230, %233 : vector<10x128xf32>
    %c120 = arith.constant 120 : index
    %c0_115 = arith.constant 0 : index
    %235 = vector.load %arg9[%c120, %c0_115] : memref<160x128xf32, #tpu.memory_space<vmem>>, vector<10x128xf32>
    tpu.vector_store %arg9[%c120, %c0_115], %234 {strides = array<i32>} : memref<160x128xf32, #tpu.memory_space<vmem>>, vector<10x128xf32>,
    %c13 = arith.constant 13 : index
    %236 = memref.load %arg4[%c13] : memref<16xf32, #tpu.memory_space<smem>>
    %c13_116 = arith.constant 13 : index
    %c0_117 = arith.constant 0 : index
    %237 = memref.load %arg3[%c13_116, %c0_117] : memref<16x3xf32, #tpu.memory_space<smem>>
    %238 = vector.broadcast %237 : f32 to vector<10x128xf32>
    %239 = arith.mulf %238, %5 : vector<10x128xf32>
    %240 = vector.broadcast %236 : f32 to vector<10x128xf32>
    %241 = arith.addf %240, %239 : vector<10x128xf32>
    %c13_118 = arith.constant 13 : index
    %c1_119 = arith.constant 1 : index
    %242 = memref.load %arg3[%c13_118, %c1_119] : memref<16x3xf32, #tpu.memory_space<smem>>
    %243 = vector.broadcast %242 : f32 to vector<10x128xf32>
    %244 = arith.mulf %243, %7 : vector<10x128xf32>
    %245 = arith.addf %241, %244 : vector<10x128xf32>
    %c13_120 = arith.constant 13 : index
    %c2_121 = arith.constant 2 : index
    %246 = memref.load %arg3[%c13_120, %c2_121] : memref<16x3xf32, #tpu.memory_space<smem>>
    %247 = vector.broadcast %246 : f32 to vector<10x128xf32>
    %248 = arith.mulf %247, %9 : vector<10x128xf32>
    %249 = arith.addf %245, %248 : vector<10x128xf32>
    %c130 = arith.constant 130 : index
    %c0_122 = arith.constant 0 : index
    %250 = vector.load %arg9[%c130, %c0_122] : memref<160x128xf32, #tpu.memory_space<vmem>>, vector<10x128xf32>
    tpu.vector_store %arg9[%c130, %c0_122], %249 {strides = array<i32>} : memref<160x128xf32, #tpu.memory_space<vmem>>, vector<10x128xf32>,
    %c14 = arith.constant 14 : index
    %251 = memref.load %arg4[%c14] : memref<16xf32, #tpu.memory_space<smem>>
    %c14_123 = arith.constant 14 : index
    %c0_124 = arith.constant 0 : index
    %252 = memref.load %arg3[%c14_123, %c0_124] : memref<16x3xf32, #tpu.memory_space<smem>>
    %253 = vector.broadcast %252 : f32 to vector<10x128xf32>
    %254 = arith.mulf %253, %5 : vector<10x128xf32>
    %255 = vector.broadcast %251 : f32 to vector<10x128xf32>
    %256 = arith.addf %255, %254 : vector<10x128xf32>
    %c14_125 = arith.constant 14 : index
    %c1_126 = arith.constant 1 : index
    %257 = memref.load %arg3[%c14_125, %c1_126] : memref<16x3xf32, #tpu.memory_space<smem>>
    %258 = vector.broadcast %257 : f32 to vector<10x128xf32>
    %259 = arith.mulf %258, %7 : vector<10x128xf32>
    %260 = arith.addf %256, %259 : vector<10x128xf32>
    %c14_127 = arith.constant 14 : index
    %c2_128 = arith.constant 2 : index
    %261 = memref.load %arg3[%c14_127, %c2_128] : memref<16x3xf32, #tpu.memory_space<smem>>
    %262 = vector.broadcast %261 : f32 to vector<10x128xf32>
    %263 = arith.mulf %262, %9 : vector<10x128xf32>
    %264 = arith.addf %260, %263 : vector<10x128xf32>
    %c140 = arith.constant 140 : index
    %c0_129 = arith.constant 0 : index
    %265 = vector.load %arg9[%c140, %c0_129] : memref<160x128xf32, #tpu.memory_space<vmem>>, vector<10x128xf32>
    tpu.vector_store %arg9[%c140, %c0_129], %264 {strides = array<i32>} : memref<160x128xf32, #tpu.memory_space<vmem>>, vector<10x128xf32>,
    %c15 = arith.constant 15 : index
    %266 = memref.load %arg4[%c15] : memref<16xf32, #tpu.memory_space<smem>>
    %c15_130 = arith.constant 15 : index
    %c0_131 = arith.constant 0 : index
    %267 = memref.load %arg3[%c15_130, %c0_131] : memref<16x3xf32, #tpu.memory_space<smem>>
    %268 = vector.broadcast %267 : f32 to vector<10x128xf32>
    %269 = arith.mulf %268, %5 : vector<10x128xf32>
    %270 = vector.broadcast %266 : f32 to vector<10x128xf32>
    %271 = arith.addf %270, %269 : vector<10x128xf32>
    %c15_132 = arith.constant 15 : index
    %c1_133 = arith.constant 1 : index
    %272 = memref.load %arg3[%c15_132, %c1_133] : memref<16x3xf32, #tpu.memory_space<smem>>
    %273 = vector.broadcast %272 : f32 to vector<10x128xf32>
    %274 = arith.mulf %273, %7 : vector<10x128xf32>
    %275 = arith.addf %271, %274 : vector<10x128xf32>
    %c15_134 = arith.constant 15 : index
    %c2_135 = arith.constant 2 : index
    %276 = memref.load %arg3[%c15_134, %c2_135] : memref<16x3xf32, #tpu.memory_space<smem>>
    %277 = vector.broadcast %276 : f32 to vector<10x128xf32>
    %278 = arith.mulf %277, %9 : vector<10x128xf32>
    %279 = arith.addf %275, %278 : vector<10x128xf32>
    %c150 = arith.constant 150 : index
    %c0_136 = arith.constant 0 : index
    %280 = vector.load %arg9[%c150, %c0_136] : memref<160x128xf32, #tpu.memory_space<vmem>>, vector<10x128xf32>
    tpu.vector_store %arg9[%c150, %c0_136], %279 {strides = array<i32>} : memref<160x128xf32, #tpu.memory_space<vmem>>, vector<10x128xf32>,
    %cst_137 = arith.constant 0.000000e+00 : f32
    %281 = vector.broadcast %cst_137 : f32 to vector<16x128xf32>
    %c0_138 = arith.constant 0 : index
    %c0_139 = arith.constant 0 : index
    %282 = vector.load %arg9[%c0_138, %c0_139] : memref<160x128xf32, #tpu.memory_space<vmem>>, vector<16x128xf32>
    %283 = vector.extract_strided_slice %40 {offsets = [0, 0], sizes = [1, 128], strides = [1, 1]} : vector<10x128xf32> to vector<1x128xf32>
    %284 = vector.broadcast %283 : vector<1x128xf32> to vector<16x128xf32>
    %285 = arith.mulf %284, %282 : vector<16x128xf32>
    %286 = arith.addf %281, %285 : vector<16x128xf32>
    %c16 = arith.constant 16 : index
    %c0_140 = arith.constant 0 : index
    %287 = vector.load %arg9[%c16, %c0_140] : memref<160x128xf32, #tpu.memory_space<vmem>>, vector<16x128xf32>
    %288 = vector.extract_strided_slice %40 {offsets = [1, 0], sizes = [1, 128], strides = [1, 1]} : vector<10x128xf32> to vector<1x128xf32>
    %289 = vector.broadcast %288 : vector<1x128xf32> to vector<16x128xf32>
    %290 = arith.mulf %289, %287 : vector<16x128xf32>
    %291 = arith.addf %286, %290 : vector<16x128xf32>
    %c32 = arith.constant 32 : index
    %c0_141 = arith.constant 0 : index
    %292 = vector.load %arg9[%c32, %c0_141] : memref<160x128xf32, #tpu.memory_space<vmem>>, vector<16x128xf32>
    %293 = vector.extract_strided_slice %40 {offsets = [2, 0], sizes = [1, 128], strides = [1, 1]} : vector<10x128xf32> to vector<1x128xf32>
    %294 = vector.broadcast %293 : vector<1x128xf32> to vector<16x128xf32>
    %295 = arith.mulf %294, %292 : vector<16x128xf32>
    %296 = arith.addf %291, %295 : vector<16x128xf32>
    %c48 = arith.constant 48 : index
    %c0_142 = arith.constant 0 : index
    %297 = vector.load %arg9[%c48, %c0_142] : memref<160x128xf32, #tpu.memory_space<vmem>>, vector<16x128xf32>
    %298 = vector.extract_strided_slice %40 {offsets = [3, 0], sizes = [1, 128], strides = [1, 1]} : vector<10x128xf32> to vector<1x128xf32>
    %299 = vector.broadcast %298 : vector<1x128xf32> to vector<16x128xf32>
    %300 = arith.mulf %299, %297 : vector<16x128xf32>
    %301 = arith.addf %296, %300 : vector<16x128xf32>
    %c64 = arith.constant 64 : index
    %c0_143 = arith.constant 0 : index
    %302 = vector.load %arg9[%c64, %c0_143] : memref<160x128xf32, #tpu.memory_space<vmem>>, vector<16x128xf32>
    %303 = vector.extract_strided_slice %40 {offsets = [4, 0], sizes = [1, 128], strides = [1, 1]} : vector<10x128xf32> to vector<1x128xf32>
    %304 = vector.broadcast %303 : vector<1x128xf32> to vector<16x128xf32>
    %305 = arith.mulf %304, %302 : vector<16x128xf32>
    %306 = arith.addf %301, %305 : vector<16x128xf32>
    %c80_144 = arith.constant 80 : index
    %c0_145 = arith.constant 0 : index
    %307 = vector.load %arg9[%c80_144, %c0_145] : memref<160x128xf32, #tpu.memory_space<vmem>>, vector<16x128xf32>
    %308 = vector.extract_strided_slice %40 {offsets = [5, 0], sizes = [1, 128], strides = [1, 1]} : vector<10x128xf32> to vector<1x128xf32>
    %309 = vector.broadcast %308 : vector<1x128xf32> to vector<16x128xf32>
    %310 = arith.mulf %309, %307 : vector<16x128xf32>
    %311 = arith.addf %306, %310 : vector<16x128xf32>
    %c96 = arith.constant 96 : index
    %c0_146 = arith.constant 0 : index
    %312 = vector.load %arg9[%c96, %c0_146] : memref<160x128xf32, #tpu.memory_space<vmem>>, vector<16x128xf32>
    %313 = vector.extract_strided_slice %40 {offsets = [6, 0], sizes = [1, 128], strides = [1, 1]} : vector<10x128xf32> to vector<1x128xf32>
    %314 = vector.broadcast %313 : vector<1x128xf32> to vector<16x128xf32>
    %315 = arith.mulf %314, %312 : vector<16x128xf32>
    %316 = arith.addf %311, %315 : vector<16x128xf32>
    %c112 = arith.constant 112 : index
    %c0_147 = arith.constant 0 : index
    %317 = vector.load %arg9[%c112, %c0_147] : memref<160x128xf32, #tpu.memory_space<vmem>>, vector<16x128xf32>
    %318 = vector.extract_strided_slice %40 {offsets = [7, 0], sizes = [1, 128], strides = [1, 1]} : vector<10x128xf32> to vector<1x128xf32>
    %319 = vector.broadcast %318 : vector<1x128xf32> to vector<16x128xf32>
    %320 = arith.mulf %319, %317 : vector<16x128xf32>
    %321 = arith.addf %316, %320 : vector<16x128xf32>
    %c128 = arith.constant 128 : index
    %c0_148 = arith.constant 0 : index
    %322 = vector.load %arg9[%c128, %c0_148] : memref<160x128xf32, #tpu.memory_space<vmem>>, vector<16x128xf32>
    %323 = vector.extract_strided_slice %40 {offsets = [8, 0], sizes = [1, 128], strides = [1, 1]} : vector<10x128xf32> to vector<1x128xf32>
    %324 = vector.broadcast %323 : vector<1x128xf32> to vector<16x128xf32>
    %325 = arith.mulf %324, %322 : vector<16x128xf32>
    %326 = arith.addf %321, %325 : vector<16x128xf32>
    %c144 = arith.constant 144 : index
    %c0_149 = arith.constant 0 : index
    %327 = vector.load %arg9[%c144, %c0_149] : memref<160x128xf32, #tpu.memory_space<vmem>>, vector<16x128xf32>
    %328 = vector.extract_strided_slice %40 {offsets = [9, 0], sizes = [1, 128], strides = [1, 1]} : vector<10x128xf32> to vector<1x128xf32>
    %329 = vector.broadcast %328 : vector<1x128xf32> to vector<16x128xf32>
    %330 = arith.mulf %329, %327 : vector<16x128xf32>
    %331 = arith.addf %326, %330 : vector<16x128xf32>
    %c0_150 = arith.constant 0 : index
    %c0_151 = arith.constant 0 : index
    %332 = vector.load %arg10[%c0_150, %c0_151] : memref<16x128xf32, #tpu.memory_space<vmem>>, vector<16x128xf32>
    tpu.vector_store %arg10[%c0_150, %c0_151], %331 {strides = array<i32>} : memref<16x128xf32, #tpu.memory_space<vmem>>, vector<16x128xf32>,
    return
  }
  func.func @transform_0(%arg0: i32) -> i32 {
    %c0_i32 = arith.constant 0 : i32
    %c0_i32_0 = arith.constant 0 : i32
    return %c0_i32 : i32
  }
  func.func @transform_1(%arg0: i32) -> i32 {
    %c0_i32 = arith.constant 0 : i32
    %c0_i32_0 = arith.constant 0 : i32
    return %c0_i32 : i32
  }
  func.func @transform_2(%arg0: i32) -> (i32, i32) {
    %c0_i32 = arith.constant 0 : i32
    %c0_i32_0 = arith.constant 0 : i32
    %c0_i32_1 = arith.constant 0 : i32
    return %c0_i32, %c0_i32_0 : i32, i32
  }
  func.func @transform_3(%arg0: i32) -> i32 {
    %c0_i32 = arith.constant 0 : i32
    %c0_i32_0 = arith.constant 0 : i32
    return %c0_i32 : i32
  }
  func.func @transform_4(%arg0: i32) -> (i32, i32) {
    %c0_i32 = arith.constant 0 : i32
    %c0_i32_0 = arith.constant 0 : i32
    %c0_i32_1 = arith.constant 0 : i32
    return %c0_i32, %c0_i32_0 : i32, i32
  }
  func.func @transform_5(%arg0: i32) -> (i32, i32) {
    %c0_i32 = arith.constant 0 : i32
    %c0_i32_0 = arith.constant 0 : i32
    %c0_i32_1 = arith.constant 0 : i32
    return %c0_i32, %c0_i32_0 : i32, i32
  }
  func.func @transform_6(%arg0: i32) -> (i32, i32, i32) {
    %c0_i32 = arith.constant 0 : i32
    %c0_i32_0 = arith.constant 0 : i32
    %c0_i32_1 = arith.constant 0 : i32
    return %c0_i32, %c0_i32_0, %arg0 : i32, i32, i32
  }
  func.func @transform_7(%arg0: i32) -> (i32, i32) {
    %c0_i32 = arith.constant 0 : i32
    %c0_i32_0 = arith.constant 0 : i32
    return %c0_i32, %arg0 : i32, i32
  }
  func.func @transform_8(%arg0: i32) -> (i32, i32) {
    %c0_i32 = arith.constant 0 : i32
    %c0_i32_0 = arith.constant 0 : i32
    return %c0_i32, %arg0 : i32, i32
  }
  func.func @transform_9(%arg0: i32) -> (i32, i32) {
    %c0_i32 = arith.constant 0 : i32
    %c0_i32_0 = arith.constant 0 : i32
    return %c0_i32, %arg0 : i32, i32
  }
}

</mosaic_0001>

<bundles_post_ra>
// kernel: single_gap.2
= control target key start
LH: loop header
LB: loop body
LE: loop exit
PB: predicated region body
PF: predicated region fallthrough
CT: control target
= control target key end

     0   :  { %s785_s0 = inlined_call_operand.<no memory space> [shape: s32[1], index: 0, kind: input, shape index: {}]   ;;  %s786_s1 = inlined_call_operand.vmem [shape: f32[3], index: 1, kind: input, shape index: {}]   ;;  %s787_s2 = inlined_call_operand.<no memory space> [shape: f32[1], index: 2, kind: input, shape index: {}]   ;;  %s788_s3 = inlined_call_operand.vmem [shape: f32[3,10,256], index: 3, kind: input, shape index: {}]   ;;  %s789_s4 = inlined_call_operand.vmem [shape: f32[3,256], index: 4, kind: input, shape index: {}]   ;;  %s790_s5 = inlined_call_operand.vmem [shape: f32[10,1], index: 5, kind: output, shape index: {0}]   ;;  %s791_s6 = inlined_call_operand.vmem [shape: f32[10,1], index: 6, kind: output, shape index: {1}]  }
   0x1   :  { %12 = sst [smem:[#allocation4]] %s785_s0 }
   0x2   :  { %13 = sst [smem:[#allocation5]] %s787_s2 }
   0x3   :  { %14 = vsyncpa [#allocation7], 0  ;;  %s667_s25 = smov 0   ;;  %s669_s26 = smov 0  }
   0x4   :  { %s671_s27 = smov 0  }
   0x5 LB: > { %s683_s0 = sadd.s32 4294967295, %s620_s27   ;;  %s686_s2 = sadd.s32 1, %s620_s27   ;;  %s620_s27 = sphi %s671_s27, %s797_s27   ;;  %s616_s26 = sphi %s669_s26, %s796_s26   ;;  %s612_s25 = sphi %s667_s25, %s795_s25  }
   0x6   : > { %s87_s28 = ssub.s32 %s620_s27, %s686_s2  ;;  %s90_s29 = sadd.s32 1, %s616_s26 }
   0x7   : > { %p88_p0 = scmp.eq.s32.totalorder %s87_s28, 0  ;;  %p97_p1 = scmp.ne.s32.totalorder %s616_s26, %s612_s25 }
   0x8   : > { %p98_p2 = scmp.eq.s32.totalorder %s620_s27, 0  ;;  %p511_p3 = scmp.ge.s32.totalorder %s620_s27, 1 }
   0x9   : > { %s696_s30 = scalar_select %p88_p0, %s616_s26, %s90_s29  }
   0xa   : > { %p698_p4 = por %p98_p2, %p97_p1  ;;  %p182_p5 = scmp.lt.s32.totalorder %s620_s27, 3 }
   0xb   : > { %p539_p7 = scmp.eq.s32.totalorder %s683_s0, 0  ;;  %s198_s11 = sshll.u32 %s786_s1, 4  ;;  %s199_s11 = int_to_ptr.vmem [resolvable:$true] %s198_s11 }
   0xc   : > { %p705_p8 = pnand %p511_p3, %p182_p5  ;;  %s579_s12 = scalar_lea.vmem %s199_s11, 16 }
   0xd   : > { %p580_p11 = scmp.ne.s32.totalorder %s199_s11, %s579_s12  ;;  %p587_p1 = scmp.lt.s32.totalorder %s199_s11, %s199_s11 }
   0xe   : > { %p535_p9 = pneg %p705_p8  ;;  %p588_p2 = scmp.lt.s32.totalorder %s579_s12, %s579_s12 }
  0x10   : > { %p536_p10 = pnand %p539_p7, %p535_p9  ;;  %p589_p3 = por %p588_p2, %p587_p1 }
  0x12   : > { %p581_p12 = pneg %p536_p10 }
  0x14   : > { %p582_p13 = pnand %p581_p12, %p580_p11 }
  0x16   : > { %p583_p0 = pneg %p582_p13 }
  0x18   : > { %p590_p5 = pnand %p589_p3, %p583_p0 }
  0x1a   : > { %593 = shalt.err (!%p590_p5)
}
  0x1b   : > { %s622_s13 = smov [#allocation6]   ;;  %p513_p6 = scmp.ge.s32.totalorder %s620_s27, 2 }
  0x1c   : > { %538 = dma.vmem_to_smem (!%p536_p10), %s199_s11, 16, %s622_s13, [#allocation7]  }
  0x1d   : > { %208 = sbr.rel (%p513_p6) target bundleno = 41 (0x29), region = 28 }
  0x22   : > { %211 = sbr.rel (!%p698_p4) target bundleno = 41 (0x29), region = 32  ;;  %s213_s14 = sand.u32 (%p698_p4), 1, %s616_s26  }
  0x23   : > { %s514_s15 = sshll.u32 (%p698_p4), %s620_s27, 3  ;;  %s529_s16 = smul.u32 (%p698_p4), 48, %s213_s14 }
  0x24   : > { %s217_s19 = scalar_lea.vmem (%p698_p4), %s788_s3, %s514_s15 }
  0x25   : > { %v256_v0 = vld [vmem:[%s217_s19] sm:$0xff] (%p698_p4)  ;;  %v258_v1 = vld [vmem:[%s217_s19 + $0x10] sm:$0xff] (%p698_p4)  ;;  %s215_s20 = scalar_lea.vmem (%p698_p4), [#allocation8], %s529_s16 }
  0x26   : > { %v260_v2 = vld [vmem:[%s217_s19 + $0x20] sm:$0xff] (%p698_p4)  ;;  %v262_v3 = vld [vmem:[%s217_s19 + $0x30] sm:$0xff] (%p698_p4)  ;;  %257 = vst [vmem:[%s215_s20] sm:$0xff] (%p698_p4), %v256_v0  ;;  %259 = vst [vmem:[%s215_s20 + $0x8] sm:$0xff] (%p698_p4), %v258_v1 }
  0x27   : > { %v264_v4 = vld [vmem:[%s217_s19 + $0x40] sm:$0xff]  ;;  %v266_v5 = vld [vmem:[%s217_s19 + $0x50] sm:$0xff]  ;;  %261 = vst [vmem:[%s215_s20 + $0x10] sm:$0xff] %v260_v2  ;;  %263 = vst [vmem:[%s215_s20 + $0x18] sm:$0xff] %v262_v3 }
  0x28   : > { %265 = vst [vmem:[%s215_s20 + $0x20] sm:$0xff] %v264_v4  ;;  %267 = vst [vmem:[%s215_s20 + $0x28] sm:$0xff] %v266_v5 }
  0x29 PF: > { %283 = sbr.rel (%p705_p8) target bundleno = 522 (0x20a), region = 74 }
  0x2e   : > { %607 = dma.done.wait (%p539_p7), [#allocation7], 16  }
  0x2f   : > { %609 = vsyncadd (%p539_p7), [#allocation7], 4294967280  ;;  %s290_s21 = sand.u32 1, %s612_s25  }
  0x30   : > { %s530_s22 = smul.u32 48, %s290_s21 }
  0x32   : > { %s731_s23 = scalar_lea.vmem [#allocation8], %s530_s22 }
  0x33   : > { %296 = sfence }
  0x34   : > { %p319_p4 = scmp.lt.s32.totalorder %s683_s0, 1  ;;  %p794_p6 = scmp.ne.s32.totalorder %s683_s0, 0 }
  0x36   : > { %s320_s24 = scalar_select %p319_p4, %s683_s0, 1 }
  0x37   : > { %326 = sbr.rel (%p794_p6) target bundleno = 63 (0x3f), region = 86 }
  0x38   : > { %s517_s27 = sshll.u32 %s320_s24, 2 }
  0x39   : > { %s738_s7 = scalar_lea.vmem %s789_s4, %s517_s27 }
  0x3c   : > { %vm327_vm0 = vcmask 7168   ;;  %vm329_vm1 = vcmask 1024   ;;  %v623_v6 = vmov -inf   ;;  %v624_v7 = vmov 0.0  }
  0x3d   : > { %328 = vst.msk [vmem:[#allocation2] sm:$0xff] %vm327_vm0, %v623_v6  ;;  %331 = vst.msk [vmem:[#allocation3] sm:$0xff] %vm327_vm0, %v624_v7 }
  0x3e   : > { %330 = vst.msk [vmem:[#allocation2 + $0x8] sm:$0x3] %vm329_vm1, %v623_v6  ;;  %332 = vst.msk [vmem:[#allocation3 + $0x8] sm:$0x3] %vm329_vm1, %v624_v7 }
  0x3f PF: > { %s333_s25 = sld [smem:[#allocation6]]  ;;  %v338_v8 = vld [vmem:[%s738_s7] sm:$0x1]  ;;  %v352_v9 = vld [vmem:[%s731_s23 + $0x8] sm:$0x3]  ;;  %v369_v12 = vlaneseq  ;;  %s525_s11 = sshll.u32 %s683_s0, 7 }
  0x40   : > { %s519_s8 = sld [smem:[#allocation6 + $0x1]]  ;;  %v522_v10 = vld [vmem:[%s731_s23 + $0x18] sm:$0x3]  ;;  %v351_v13 = vld [vmem:[%s731_s23] sm:$0xff]  ;;  %v521_v14 = vld [vmem:[%s731_s23 + $0x10] sm:$0xff]  ;;  %v378_v30 = vstv %s525_s11  ;;  %vm387_vm3 = vcmask 1041408  }
  0x41   : > { %s520_s9 = sld [smem:[#allocation6 + $0x2]]  ;;  %v343_v15 = vld [vmem:[%s738_s7 + $0x1] sm:$0x1]  ;;  %v347_v20 = vld [vmem:[%s738_s7 + $0x2] sm:$0x1]  ;;  %v370_v26 = vshrl.u32 %v369_v12, 7 }
  0x42   : > { %s336_s10 = sld [smem:[#allocation5]]  ;;  %v524_v22 = vld [vmem:[%s731_s23 + $0x28] sm:$0x3]  ;;  %v523_v27 = vld [vmem:[%s731_s23 + $0x20] sm:$0xff]  ;;  %v376_v29 = vand.u32 127, %v369_v12  ;;  %v625_v50 = vmov 0  }
  0x43   : > { %s380_s12 = sld [smem:[#allocation4]]  ;;  %v371_v38 = vsub.s32 0, %v370_v26  ;;  %569 = vset.pattern.permute.xlu1 %v625_v50  ;;  %570 = vset.pattern.permute.xlu0 %v625_v50  ;;  %vm430_vm4 = vcmask 1024   ;;  %vm428_vm5 = vcmask 7168   ;;  %p526_p7 = scmp.ne.s32.totalorder %s683_s0, 1 }
  0x44   : > { %v379_v39 = vadd.s32 %v378_v30, %v376_v29  ;;  %v391_v54 = vld [vmem:[#allocation2] sm:$0xff] }
  0x45   : > { %v339_v11 = vstv %s333_s25  ;;  %v392_v51 = vld [vmem:[#allocation2 + $0x8] sm:$0x3]  ;;  %v418_v7 = vld [vmem:[#allocation3 + $0x8] sm:$0x3] }
  0x46   : > { %v344_v16 = vstv %s519_s8  ;;  %v340_v17 = vmul.f32 %v339_v11, %v338_v8  ;;  %v354_v18 = vmul.f32 %v352_v9, %v339_v11  ;;  %v353_v23 = vmul.f32 %v351_v13, %v339_v11 }
  0x47   : > { %v359_v19 = vmul.f32 %v522_v10, %v344_v16  ;;  %v348_v21 = vstv %s520_s9  ;;  %v358_v24 = vmul.f32 %v521_v14, %v344_v16  ;;  %v345_v25 = vmul.f32 %v344_v16, %v343_v15  ;;  %v417_v10 = vld [vmem:[#allocation3] sm:$0xff] }
  0x48   : > { %s337_s13 = smul.f32 2.0, %s336_s10  ;;  %v349_v32 = vmul.f32 %v348_v21, %v347_v20  ;;  %v366_v34 = vmul.f32 %v524_v22, %v348_v21  ;;  %v365_v36 = vmul.f32 %v523_v27, %v348_v21 }
  0x49   : > { %v361_v33 = vadd.f32 %v359_v19, %v354_v18  ;;  %v360_v35 = vadd.f32 %v358_v24, %v353_v23  ;;  %v381_v42 = vstv %s380_s12 }
  0x4a   : > { %v341_v28 = vstv %s337_s13  ;;  %vm382_vm2 = vcmp.lt.s32.totalorder %v379_v39, %v381_v42 }
  0x4b   : > { %v342_v31 = vadd.f32 %v341_v28, %v340_v17  ;;  %v368_v41 = vadd.f32 %v366_v34, %v361_v33  ;;  %v367_v43 = vadd.f32 %v365_v36, %v360_v35 }
  0x4d   : > { %v346_v37 = vadd.f32 %v345_v25, %v342_v31 }
  0x4f   : > { %v350_v40 = vadd.f32 %v349_v32, %v346_v37 }
  0x51   : > { %v372_v44 = vrot.slane %v350_v40, %v371_v38 }
  0x53   : > { %v374_v45 = vadd.f32 %v372_v44, %v368_v41  ;;  %v373_v46 = vadd.f32 %v372_v44, %v367_v43 }
  0x55   : > { %v384_v47 = vsel %vm382_vm2, %v374_v45, -inf  ;;  %v383_v49 = vsel %vm382_vm2, %v373_v46, -inf }
  0x56   : > { %v388_v48 = vsel %vm387_vm3, %v384_v47, -inf }
  0x57   : > { %389 = vmax.xlane.f32.xlu0 %v388_v48 }
  0x5b   : > { %385 = vmax.xlane.f32.xlu0 %v383_v49 }
  0xe0   : > { %v390_v52 = vpop.xlane.xlu0 %389 }
  0xe1   : > { %v394_v53 = vmax.f32 %v392_v51, %v390_v52 }
  0xe3   : > { %v396_v55 = vsub.f32 %v392_v51, %v394_v53  ;;  %433 = vst.msk [vmem:[#allocation2 + $0x8] sm:$0x3] %vm430_vm4, %v394_v53  ;;  %408 = vperm.xlu1 %569, %v394_v53  }
  0xe4   : > { %v386_v56 = vpop.xlane.xlu0 %385 }
  0xe5   : > { %v393_v57 = vmax.f32 %v391_v54, %v386_v56  ;;  %v399_v4 = vmul.f32 1.442695, %v396_v55 }
  0xe7   : > { %v395_v58 = vsub.f32 %v391_v54, %v393_v57  ;;  %432 = vst.msk [vmem:[#allocation2] sm:$0xff] %vm428_vm5, %v393_v57  ;;  %403 = vperm.xlu1 %569, %v393_v57  }
  0xe9   : > { %v397_v5 = vmul.f32 1.442695, %v395_v58 }
 0x15e   : > { %v409_v59 = vpop.permute.xlu1 %408 }
 0x15f   : > { %v412_v60 = vsub.f32 %v384_v47, %v409_v59 }
 0x161   : > { %v415_v61 = vmul.f32 1.442695, %v412_v60 }
 0x162   : > { %v404_v62 = vpop.permute.xlu1 %403 }
 0x163   : > { %571 = vpow2.f32 %v415_v61  ;;  %v411_v63 = vsub.f32 %v383_v49, %v404_v62 }
 0x165   : > { %v413_v0 = vmul.f32 1.442695, %v411_v63 }
 0x167   : > { %573 = vpow2.f32 %v413_v0 }
 0x168   : > { %575 = vpow2.f32 %v399_v4 }
 0x169   : > { %577 = vpow2.f32 %v397_v5 }
 0x170   : > { %v572_v1 = vpop.eup %571 }
 0x171   : > { %v423_v2 = vsel %vm387_vm3, %v572_v1, 0.0 }
 0x172   : > { %424 = vadd.xlane.f32.xlu1 %v423_v2 }
 0x174   : > { %v574_v3 = vpop.eup %573 }
 0x175   : > { %421 = vadd.xlane.f32.xlu0 %v574_v3  ;;  %v576_v6 = vpop.eup %575 }
 0x176   : > { %v578_v8 = vpop.eup %577  ;;  %v420_v9 = vmul.f32 %v576_v6, %v418_v7 }
 0x177   : > { %v419_v13 = vmul.f32 %v578_v8, %v417_v10 }
 0x1fb   : > { %v425_v11 = vpop.xlane.xlu1 %424 }
 0x1fc   : > { %v427_v12 = vadd.f32 %v425_v11, %v420_v9 }
 0x1fd   : > { %437 = sbr.rel (%p526_p7) target bundleno = 522 (0x20a), region = 90 }
 0x1fe   : > { %431 = vst.msk [vmem:[#allocation3 + $0x8] sm:$0x3] %vm430_vm4, %v427_v12  ;;  %v422_v14 = vpop.xlane.xlu0 %421 }
 0x1ff   : > { %v426_v15 = vadd.f32 %v422_v14, %v419_v13 }
 0x201   : > { %429 = vst.msk [vmem:[#allocation3] sm:$0xff] %vm428_vm5, %v426_v15 }
 0x202   : > { %v438_v16 = vld [vmem:[#allocation2] sm:$0xff]  ;;  %v439_v17 = vld [vmem:[#allocation2 + $0x8] sm:$0x3] }
 0x203   : > { %440 = vst.msk [vmem:[%s790_s5] sm:$0xff] %vm428_vm5, %v438_v16 }
 0x204   : > { %441 = vst.msk [vmem:[%s790_s5 + $0x8] sm:$0x3] %vm430_vm4, %v439_v17 }
 0x205   : > { %v443_v19 = vld [vmem:[#allocation3 + $0x8] sm:$0x3] }
 0x206   : > { %445 = vst.msk [vmem:[%s791_s6 + $0x8] sm:$0x3] %vm430_vm4, %v443_v19 }
 0x208   : > { %v442_v18 = vld [vmem:[#allocation3] sm:$0xff] }
 0x209   : > { %444 = vst.msk [vmem:[%s791_s6] sm:$0xff] %vm428_vm5, %v442_v18 }
 0x20a PF: > { %p17_p8 = scmp.ge.s32.totalorder %s686_s2, 4   ;;  %s795_s25 = smov %s616_s26 }
 0x20b   : > { %s796_s26 = smov %s696_s30  ;;  %s797_s27 = smov %s686_s2 }
 0x20c   :  { %19 = sbr.rel (!%p17_p8) target bundleno = 5 (0x5), region = 135 }
 0x211   :  { %463 = vsyncpa [#allocation7], 1 }
 0x212   :  { %465 = vsyncpa [#allocation7 + $0x1], 1 }

// kernel: single_gap.3
= control target key start
LH: loop header
LB: loop body
LE: loop exit
PB: predicated region body
PF: predicated region fallthrough
CT: control target
= control target key end

     0   :  { %s2118_s0 = inlined_call_operand.vmem [shape: f32[3], index: 0, kind: input, shape index: {}]   ;;  %s2119_s1 = inlined_call_operand.<no memory space> [shape: f32[1], index: 1, kind: input, shape index: {}]   ;;  %s2120_s2 = inlined_call_operand.vmem [shape: f32[16,3], index: 2, kind: input, shape index: {}]   ;;  %s2121_s3 = inlined_call_operand.vmem [shape: f32[16], index: 3, kind: input, shape index: {}]   ;;  %s2122_s4 = inlined_call_operand.vmem [shape: f32[10,1], index: 4, kind: input, shape index: {}]   ;;  %s2123_s5 = inlined_call_operand.vmem [shape: f32[10,1], index: 5, kind: input, shape index: {}]   ;;  %s2124_s6 = inlined_call_operand.vmem [shape: f32[3,10,256], index: 6, kind: input, shape index: {}]   ;;  %s2125_s7 = inlined_call_operand.vmem [shape: f32[3,256], index: 7, kind: input, shape index: {}]   ;;  %s2126_s8 = inlined_call_operand.hbm [shape: f32[160,256], index: 8, kind: output, shape index: {0}]   ;;  %s2127_s9 = inlined_call_operand.vmem [shape: f32[16,256], index: 9, kind: output, shape index: {1}]  }
   0x1   :  { %2131 = sst [smem:[#allocation15_spill]] %s2118_s0 }
   0x2   :  { %2132 = sst [smem:[#allocation16_spill]] %s2120_s2 }
   0x3   :  { %2133 = sst [smem:[#allocation17_spill]] %s2121_s3 }
   0x4   :  { %2134 = sst [smem:[#allocation18_spill]] %s2122_s4 }
   0x5   :  { %2135 = sst [smem:[#allocation19_spill]] %s2123_s5 }
   0x6   :  { %15 = sst [smem:[#allocation2]] %s2119_s1 }
   0x7   :  { %16 = vsyncpa [#allocation5], 0 }
   0x8   :  { %17 = vsyncpa [#allocation7], 0 }
   0x9   :  { %18 = vsyncpa [#allocation4], 0 }
   0xa   :  { %20 = vsyncpa [#allocation4 + $0x1], 0  ;;  %s1533_s11 = smov 0   ;;  %s1535_s12 = smov 0  }
   0xb   :  { %s1537_s13 = smov 0   ;;  %s1539_s14 = smov 0  }
   0xc LB: > { %s1554_s1 = sadd.s32 4294967295, %s1468_s14   ;;  %s1180_s15 = sadd.s32 4294967294, %s1468_s14   ;;  %s1468_s14 = sphi %s1539_s14, %s2158_s14   ;;  %s1464_s13 = sphi %s1537_s13, %s2157_s13   ;;  %s1460_s12 = sphi %s1535_s12, %s2156_s12   ;;  %s1456_s11 = sphi %s1533_s11, %s2155_s11  }
   0xd   : > { %s1558_s16 = sadd.s32 1, %s1468_s14   ;;  %s159_s17 = sadd.s32 1, %s1464_s13 }
   0xe   : > { %s156_s18 = ssub.s32 %s1468_s14, %s1558_s16  ;;  %p166_p0 = scmp.ne.s32.totalorder %s1464_s13, %s1460_s12 }
   0xf   : > { %p157_p1 = scmp.eq.s32.totalorder %s156_s18, 0  ;;  %p167_p2 = scmp.eq.s32.totalorder %s1468_s14, 0 }
  0x10   : > { %p222_p3 = scmp.eq.s32.totalorder %s1554_s1, 1  ;;  %p227_p4 = scmp.ne.s32.totalorder %s1460_s12, %s1456_s11 }
  0x11   : > { %s1570_s19 = scalar_select %p157_p1, %s1464_s13, %s159_s17  }
  0x12   : > { %p1572_p5 = por %p167_p2, %p166_p0  ;;  %p1576_p6 = por %p222_p3, %p166_p0 }
  0x13   : > { %p228_p7 = scmp.eq.s32.totalorder %s1180_s15, 1  ;;  %p1181_p8 = scmp.ge.s32.totalorder %s1468_s14, 1 }
  0x14   : > { %s2136_s20 = scalar_select %p1572_p5, 1, 0 }
  0x15   : > { %s2137_s21 = scalar_select %p1576_p6, 1, 0 }
  0x16   : > { %p261_p9 = scmp.lt.s32.totalorder %s1468_s14, 3  ;;  %p1582_p10 = por %p228_p7, %p227_p4 }
  0x17   : > { %p2128_p11 = scmp.eq.s32.totalorder %s1554_s1, 0  ;;  %s2140_s2 = sld [smem:[#allocation16_spill]] }
  0x18   : > { %s2138_s22 = scalar_select %p1582_p10, 1, 0 }
  0x19   : > { %p1587_p12 = pnand %p1181_p8, %p261_p9  ;;  %s2141_s0 = sld [smem:[#allocation15_spill]] }
  0x1a   : > { %s2143_s3 = sld [smem:[#allocation17_spill]] }
  0x1b   : > { %s2139_s23 = scalar_select %p1587_p12, 1, 0 }
  0x1c   : > { %p1283_p13 = pneg %p1587_p12 }
  0x1d   : > { %s287_s26 = sshll.u32 %s2140_s2, 4  ;;  %s288_s26 = int_to_ptr.vmem [resolvable:$true] %s287_s26 }
  0x1e   : > { %p1601_p0 = pnand %p2128_p11, %p1283_p13  ;;  %s1355_s18 = scalar_lea.vmem %s288_s26, 256 }
  0x1f   : > { %s274_s29 = sshll.u32 %s2141_s0, 4  ;;  %p1356_p1 = scmp.ne.s32.totalorder %s288_s26, %s1355_s18  ;;  %s275_s29 = int_to_ptr.vmem [resolvable:$true] %s274_s29 }
  0x20   : > { %s301_s17 = sshll.u32 %s2143_s3, 4  ;;  %p1357_p2 = pneg %p1601_p0  ;;  %s1608_s17 = int_to_ptr.vmem [resolvable:$true] %s301_s17 }
  0x21   : > { %p1363_p7 = scmp.lt.s32.totalorder %s288_s26, %s288_s26  ;;  %p1364_p8 = scmp.lt.s32.totalorder %s1355_s18, %s1355_s18 }
  0x22   : > { %p1358_p3 = pnand %p1357_p2, %p1356_p1 }
  0x23   : > { %p1365_p9 = por %p1364_p8, %p1363_p7 }
  0x24   : > { %p1359_p4 = pneg %p1358_p3 }
  0x26   : > { %p1366_p13 = pnand %p1365_p9, %p1359_p4 }
  0x28   : > { %1369 = shalt.err (!%p1366_p13)
}
  0x29   : > { %s1470_s24 = smov [#allocation6]   ;;  %s1471_s25 = smov 128  }
  0x2a   : > { %s1472_s27 = smov 8   ;;  %s1370_s28 = scalar_lea.vmem %s275_s29, 16 }
  0x2b   : > { %1289 = dma.vmem_to_smem (!%p1601_p0), %s288_s26, 256, %s1470_s24, [#allocation7], %s1471_s25, %s1471_s25, %s1472_s27  }
  0x2c   : > { %p1371_p11 = scmp.ne.s32.totalorder %s275_s29, %s1370_s28  ;;  %p1378_p1 = scmp.lt.s32.totalorder %s275_s29, %s275_s29 }
  0x2d   : > { %p1379_p3 = scmp.lt.s32.totalorder %s1370_s28, %s1370_s28 }
  0x2e   : > { %p1373_p10 = pnand %p1371_p11, %p1357_p2 }
  0x2f   : > { %p1380_p12 = por %p1379_p3, %p1378_p1 }
  0x30   : > { %p1374_p6 = pneg %p1373_p10 }
  0x32   : > { %p1381_p5 = pnand %p1380_p12, %p1374_p6 }
  0x34   : > { %1384 = shalt.err (!%p1381_p5)
}
  0x35   : > { %s1473_s10 = smov [#allocation3]   ;;  %s1385_s26 = scalar_lea.vmem %s1608_s17, 16 }
  0x36   : > { %1286 = dma.vmem_to_smem (!%p1601_p0), %s275_s29, 16, %s1473_s10, [#allocation5]  }
  0x37   : > { %p1386_p4 = scmp.ne.s32.totalorder %s1608_s17, %s1385_s26  ;;  %p1393_p10 = scmp.lt.s32.totalorder %s1608_s17, %s1608_s17 }
  0x38   : > { %p1394_p8 = scmp.lt.s32.totalorder %s1385_s26, %s1385_s26 }
  0x39   : > { %p1388_p7 = pnand %p1386_p4, %p1357_p2 }
  0x3a   : > { %p1395_p9 = por %p1394_p8, %p1393_p10 }
  0x3b   : > { %p1389_p11 = pneg %p1388_p7 }
  0x3d   : > { %p1396_p6 = pnand %p1395_p9, %p1389_p11 }
  0x3f   : > { %1399 = shalt.err (!%p1396_p6)
}
  0x40   : > { %s1474_s15 = smov [#allocation8]   ;;  %p1185_p5 = scmp.ge.s32.totalorder %s1468_s14, 2 }
  0x41   : > { %1292 = dma.vmem_to_smem (!%p1601_p0), %s1608_s17, 16, %s1474_s15, [#allocation7]  }
  0x42   : > { %314 = sbr.rel (%p1185_p5) target bundleno = 78 (0x4e), region = 40  ;;  %p2144_p12 = scmp.ne.s32.totalorder (!%p1185_p5), %s2136_s20, 0 }
  0x47   : > { %317 = sbr.rel (!%p2144_p12) target bundleno = 78 (0x4e), region = 44  ;;  %s319_s29 = sand.u32 (%p2144_p12), 1, %s1464_s13  }
  0x48   : > { %s1186_s18 = sshll.u32 (%p2144_p12), %s1468_s14, 3  ;;  %s1266_s24 = smul.u32 (%p2144_p12), 48, %s319_s29 }
  0x49   : > { %s323_s28 = scalar_lea.vmem (%p2144_p12), %s2124_s6, %s1186_s18 }
  0x4a   : > { %v362_v0 = vld [vmem:[%s323_s28] sm:$0xff] (%p2144_p12)  ;;  %v364_v1 = vld [vmem:[%s323_s28 + $0x10] sm:$0xff] (%p2144_p12)  ;;  %s321_s30 = scalar_lea.vmem (%p2144_p12), [#allocation9], %s1266_s24 }
  0x4b   : > { %v366_v2 = vld [vmem:[%s323_s28 + $0x20] sm:$0xff] (%p2144_p12)  ;;  %v368_v3 = vld [vmem:[%s323_s28 + $0x30] sm:$0xff] (%p2144_p12)  ;;  %363 = vst [vmem:[%s321_s30] sm:$0xff] (%p2144_p12), %v362_v0  ;;  %365 = vst [vmem:[%s321_s30 + $0x8] sm:$0xff] (%p2144_p12), %v364_v1 }
  0x4c   : > { %v370_v4 = vld [vmem:[%s323_s28 + $0x40] sm:$0xff]  ;;  %v372_v5 = vld [vmem:[%s323_s28 + $0x50] sm:$0xff]  ;;  %367 = vst [vmem:[%s321_s30 + $0x10] sm:$0xff] %v366_v2  ;;  %369 = vst [vmem:[%s321_s30 + $0x18] sm:$0xff] %v368_v3 }
  0x4d   : > { %371 = vst [vmem:[%s321_s30 + $0x20] sm:$0xff] %v370_v4  ;;  %373 = vst [vmem:[%s321_s30 + $0x28] sm:$0xff] %v372_v5 }
  0x4e PF: > { %p2145_p0 = scmp.ne.s32.totalorder %s2139_s23, 0 }
  0x4f   : > { %p2146_p2 = scmp.eq.s32.totalorder (!%p2145_p0), %s1554_s1, 0 }
  0x50   : > { %389 = sbr.rel (%p2145_p0) target bundleno = 277 (0x115), region = 86 }
  0x55   : > { %1443 = dma.done.wait (%p2146_p2), [#allocation5], 16   ;;  %p2147_p13 = pmov %p2146_p2 }
  0x56   : > { %p2148_p1 = pmov %p2146_p2 }
  0x57   : > { %1445 = vsyncadd (%p2147_p13), [#allocation5], 4294967280 }
  0x58   : > { %1447 = dma.done.wait (%p2148_p1), [#allocation7], 272   ;;  %p2149_p3 = pmov %p2148_p1 }
  0x59   : > { %s1653_s20 = sand.u32 1, %s1460_s12  }
  0x5a   : > { %1449 = vsyncadd (%p2149_p3), [#allocation7], 4294967024  ;;  %s1267_s17 = smul.u32 48, %s1653_s20 }
  0x5c   : > { %s1656_s10 = scalar_lea.vmem [#allocation9], %s1267_s17 }
  0x5d   : > { %410 = sfence }
  0x5e   : > { %s2150_s4 = sld [smem:[#allocation18_spill]]  ;;  %v1475_v8 = vmov 0   ;;  %v1677_v11 = vld [vmem:[%s1656_s10] sm:$0xff]  ;;  %v1680_v12 = vld [vmem:[%s1656_s10 + $0x8] sm:$0x3]  ;;  %v1685_v15 = vld [vmem:[%s1656_s10 + $0x10] sm:$0xff] }
  0x5f   : > { %1345 = vset.pattern.permute.xlu0 %v1475_v8  ;;  %1346 = vset.pattern.permute.xlu1 %v1475_v8  ;;  %s2151_s5 = sld [smem:[#allocation19_spill]]  ;;  %v1688_v16 = vld [vmem:[%s1656_s10 + $0x18] sm:$0x3]  ;;  %v1695_v20 = vld [vmem:[%s1656_s10 + $0x20] sm:$0xff]  ;;  %s1268_s27 = smul.u32 160, %s1653_s20 }
  0x60   : > { %s528_s28 = sld [smem:[#allocation8]]  ;;  %v1703_v24 = vld [vmem:[%s1656_s10 + $0x28] sm:$0x3]  ;;  %p448_p4 = scmp.lt.s32.totalorder %s1554_s1, 1 }
  0x61   : > { %s529_s30 = sld [smem:[#allocation6]]  ;;  %p2152_p11 = scmp.ne.s32.totalorder %s2137_s21, 0 }
  0x62   : > { %s1199_s17 = sld [smem:[#allocation6 + $0x1]] }
  0x63   : > { %s1200_s23 = sld [smem:[#allocation6 + $0x2]] }
  0x64   : > { %v494_v6 = vld [vmem:[%s2150_s4] sm:$0xff]  ;;  %v495_v7 = vld [vmem:[%s2150_s4 + $0x8] sm:$0x3]  ;;  %s1670_s26 = sld [smem:[#allocation8 + $0x1]] }
  0x65   : > { %498 = vperm.xlu0 %1345, %v494_v6   ;;  %503 = vperm.xlu1 %1346, %v495_v7   ;;  %v512_v9 = vld [vmem:[%s2151_s5] sm:$0xff]  ;;  %v513_v10 = vld [vmem:[%s2151_s5 + $0x8] sm:$0x3]  ;;  %s1672_s15 = sld [smem:[#allocation6 + $0x80]] }
  0x66   : > { %s1674_s29 = sld [smem:[#allocation6 + $0x81]]  ;;  %v533_v14 = vstv %s528_s28 }
  0x67   : > { %v530_v13 = vstv %s529_s30  ;;  %s1682_s18 = sld [smem:[#allocation6 + $0x82]] }
  0x68   : > { %v537_v17 = vstv %s1199_s17  ;;  %s1690_s24 = sld [smem:[#allocation8 + $0x2]]  ;;  %v531_v18 = vmul.f32 %v530_v13, %v1677_v11  ;;  %v532_v19 = vmul.f32 %v530_v13, %v1680_v12 }
  0x69   : > { %516 = vperm.xlu0 %1345, %v512_v9   ;;  %521 = vperm.xlu1 %1346, %v513_v10   ;;  %v543_v21 = vstv %s1200_s23  ;;  %s1697_s25 = sld [smem:[#allocation6 + $0x100]]  ;;  %v538_v22 = vmul.f32 %v1685_v15, %v537_v17  ;;  %v539_v23 = vmul.f32 %v1688_v16, %v537_v17 }
  0x6a   : > { %s1705_s28 = sld [smem:[#allocation6 + $0x101]]  ;;  %v534_v25 = vadd.f32 %v533_v14, %v531_v18  ;;  %v535_v26 = vadd.f32 %v533_v14, %v532_v19  ;;  %v544_v27 = vmul.f32 %v1695_v20, %v543_v21  ;;  %v555_v29 = vstv %s1670_s26 }
  0x6b   : > { %v552_v28 = vstv %s1672_s15  ;;  %s1710_s30 = sld [smem:[#allocation6 + $0x102]]  ;;  %v545_v30 = vmul.f32 %v1703_v24, %v543_v21 }
  0x6c   : > { %v559_v31 = vstv %s1674_s29  ;;  %s1714_s17 = sld [smem:[#allocation8 + $0x3]]  ;;  %v540_v32 = vadd.f32 %v538_v22, %v534_v25  ;;  %v541_v33 = vadd.f32 %v539_v23, %v535_v26  ;;  %v553_v34 = vmul.f32 %v552_v28, %v1677_v11  ;;  %s1735_s29 = scalar_lea.vmem [#allocation10], %s1268_s27 }
  0x6d   : > { %v565_v35 = vstv %s1682_s18  ;;  %s1718_s10 = sld [smem:[#allocation6 + $0x180]]  ;;  %v554_v36 = vmul.f32 %v552_v28, %v1680_v12  ;;  %v560_v37 = vmul.f32 %v1685_v15, %v559_v31  ;;  %v561_v45 = vmul.f32 %v1688_v16, %v559_v31 }
  0x6e   : > { %s1722_s23 = sld [smem:[#allocation6 + $0x181]]  ;;  %v1724_v38 = vadd.f32 %v544_v27, %v540_v32  ;;  %v547_v39 = vadd.f32 %v545_v30, %v541_v33  ;;  %v556_v40 = vadd.f32 %v555_v29, %v553_v34  ;;  %v577_v42 = vstv %s1690_s24 }
  0x6f   : > { %v574_v41 = vstv %s1697_s25  ;;  %s1728_s26 = sld [smem:[#allocation6 + $0x182]]  ;;  %v557_v43 = vadd.f32 %v555_v29, %v554_v36  ;;  %v566_v47 = vmul.f32 %v1695_v20, %v565_v35  ;;  %v567_v49 = vmul.f32 %v1703_v24, %v565_v35 }
  0x70   : > { %v581_v44 = vstv %s1705_s28  ;;  %s1731_s15 = sld [smem:[#allocation8 + $0x4]]  ;;  %548 = vst [vmem:[%s1735_s29] sm:$0xff] %v1724_v38  ;;  %549 = vst [vmem:[%s1735_s29 + $0x8] sm:$0x3] %v547_v39  ;;  %v562_v46 = vadd.f32 %v560_v37, %v556_v40  ;;  %v575_v50 = vmul.f32 %v574_v41, %v1677_v11  ;;  %v576_v51 = vmul.f32 %v574_v41, %v1680_v12 }
  0x71   : > { %v587_v48 = vstv %s1710_s30  ;;  %s1743_s18 = sld [smem:[#allocation6 + $0x200]]  ;;  %v563_v53 = vadd.f32 %v561_v45, %v557_v43  ;;  %v582_v55 = vmul.f32 %v1685_v15, %v581_v44  ;;  %v583_v59 = vmul.f32 %v1688_v16, %v581_v44 }
  0x72   : > { %v599_v52 = vstv %s1714_s17  ;;  %s1749_s24 = sld [smem:[#allocation6 + $0x201]]  ;;  %v568_v54 = vadd.f32 %v566_v47, %v562_v46  ;;  %v578_v57 = vadd.f32 %v577_v42, %v575_v50  ;;  %v579_v58 = vadd.f32 %v577_v42, %v576_v51 }
  0x73   : > { %v596_v56 = vstv %s1718_s10  ;;  %s1753_s25 = sld [smem:[#allocation6 + $0x202]]  ;;  %v569_v61 = vadd.f32 %v567_v49, %v563_v53  ;;  %v588_v62 = vmul.f32 %v1695_v20, %v587_v48  ;;  %v589_v63 = vmul.f32 %v1703_v24, %v587_v48 }
  0x74   : > { %v603_v60 = vstv %s1722_s23  ;;  %s1757_s27 = sld [smem:[#allocation8 + $0x5]]  ;;  %570 = vst [vmem:[%s1735_s29 + $0xa] sm:$0xff] %v568_v54  ;;  %v584_v1 = vadd.f32 %v582_v55, %v578_v57  ;;  %v585_v2 = vadd.f32 %v583_v59, %v579_v58  ;;  %v597_v3 = vmul.f32 %v596_v56, %v1677_v11 }
  0x75   : > { %v609_v0 = vstv %s1728_s26  ;;  %s1763_s28 = sld [smem:[#allocation6 + $0x280]]  ;;  %571 = vst [vmem:[%s1735_s29 + $0x12] sm:$0x3] %v569_v61  ;;  %v598_v5 = vmul.f32 %v596_v56, %v1680_v12  ;;  %v604_v6 = vmul.f32 %v1685_v15, %v603_v60  ;;  %v605_v7 = vmul.f32 %v1688_v16, %v603_v60 }
  0x76   : > { %v621_v4 = vstv %s1731_s15  ;;  %s1767_s30 = sld [smem:[#allocation6 + $0x281]]  ;;  %v590_v9 = vadd.f32 %v588_v62, %v584_v1  ;;  %v591_v10 = vadd.f32 %v589_v63, %v585_v2  ;;  %v600_v13 = vadd.f32 %v599_v52, %v597_v3 }
  0x77   : > { %v618_v8 = vstv %s1743_s18  ;;  %s1774_s17 = sld [smem:[#allocation6 + $0x282]]  ;;  %v601_v17 = vadd.f32 %v599_v52, %v598_v5  ;;  %v610_v18 = vmul.f32 %v1695_v20, %v609_v0  ;;  %v611_v19 = vmul.f32 %v1703_v24, %v609_v0 }
  0x78   : > { %v625_v14 = vstv %s1749_s24  ;;  %s1777_s10 = sld [smem:[#allocation8 + $0x6]]  ;;  %592 = vst [vmem:[%s1735_s29 + $0x14] sm:$0xff] %v590_v9  ;;  %593 = vst [vmem:[%s1735_s29 + $0x1c] sm:$0x3] %v591_v10  ;;  %v606_v22 = vadd.f32 %v604_v6, %v600_v13  ;;  %v619_v23 = vmul.f32 %v618_v8, %v1677_v11  ;;  %v620_v25 = vmul.f32 %v618_v8, %v1680_v12 }
  0x79   : > { %v631_v21 = vstv %s1753_s25  ;;  %s1782_s23 = sld [smem:[#allocation6 + $0x300]]  ;;  %v607_v27 = vadd.f32 %v605_v7, %v601_v17  ;;  %v626_v28 = vmul.f32 %v1685_v15, %v625_v14  ;;  %v627_v29 = vmul.f32 %v1688_v16, %v625_v14 }
  0x7a   : > { %v643_v26 = vstv %s1757_s27  ;;  %s1789_s26 = sld [smem:[#allocation6 + $0x301]]  ;;  %v612_v31 = vadd.f32 %v610_v18, %v606_v22  ;;  %v622_v32 = vadd.f32 %v621_v4, %v619_v23  ;;  %v623_v33 = vadd.f32 %v621_v4, %v620_v25 }
  0x7b   : > { %v640_v30 = vstv %s1763_s28  ;;  %s1794_s15 = sld [smem:[#allocation6 + $0x302]]  ;;  %v613_v35 = vadd.f32 %v611_v19, %v607_v27  ;;  %v632_v36 = vmul.f32 %v1695_v20, %v631_v21  ;;  %v633_v37 = vmul.f32 %v1703_v24, %v631_v21 }
  0x7c   : > { %v647_v34 = vstv %s1767_s30  ;;  %s1797_s18 = sld [smem:[#allocation8 + $0x7]]  ;;  %614 = vst [vmem:[%s1735_s29 + $0x1e] sm:$0xff] %v612_v31  ;;  %v628_v40 = vadd.f32 %v626_v28, %v622_v32  ;;  %v629_v41 = vadd.f32 %v627_v29, %v623_v33  ;;  %v641_v42 = vmul.f32 %v640_v30, %v1677_v11 }
  0x7d   : > { %v653_v39 = vstv %s1774_s17  ;;  %s1802_s24 = sld [smem:[#allocation6 + $0x380]]  ;;  %615 = vst [vmem:[%s1735_s29 + $0x26] sm:$0x3] %v613_v35  ;;  %v642_v44 = vmul.f32 %v640_v30, %v1680_v12  ;;  %v648_v45 = vmul.f32 %v1685_v15, %v647_v34  ;;  %v649_v46 = vmul.f32 %v1688_v16, %v647_v34 }
  0x7e   : > { %v665_v43 = vstv %s1777_s10  ;;  %s1807_s25 = sld [smem:[#allocation6 + $0x381]]  ;;  %v1816_v48 = vadd.f32 %v632_v36, %v628_v40  ;;  %v635_v49 = vadd.f32 %v633_v37, %v629_v41  ;;  %v644_v50 = vadd.f32 %v643_v26, %v641_v42 }
  0x7f   : > { %v662_v47 = vstv %s1782_s23  ;;  %s1814_s27 = sld [smem:[#allocation6 + $0x382]]  ;;  %v645_v52 = vadd.f32 %v643_v26, %v642_v44  ;;  %v654_v53 = vmul.f32 %v1695_v20, %v653_v39  ;;  %v655_v54 = vmul.f32 %v1703_v24, %v653_v39 }
  0x80   : > { %v669_v51 = vstv %s1789_s26  ;;  %s1819_s28 = sld [smem:[#allocation8 + $0x8]]  ;;  %636 = vst [vmem:[%s1735_s29 + $0x28] sm:$0xff] %v1816_v48  ;;  %637 = vst [vmem:[%s1735_s29 + $0x30] sm:$0x3] %v635_v49  ;;  %v650_v56 = vadd.f32 %v648_v45, %v644_v50  ;;  %v663_v57 = vmul.f32 %v662_v47, %v1677_v11  ;;  %v664_v58 = vmul.f32 %v662_v47, %v1680_v12 }
  0x81   : > { %v675_v55 = vstv %s1794_s15  ;;  %s1824_s30 = sld [smem:[#allocation6 + $0x400]]  ;;  %v651_v60 = vadd.f32 %v649_v46, %v645_v52  ;;  %v670_v61 = vmul.f32 %v1685_v15, %v669_v51  ;;  %v671_v62 = vmul.f32 %v1688_v16, %v669_v51 }
  0x82   : > { %v687_v59 = vstv %s1797_s18  ;;  %s1832_s17 = sld [smem:[#allocation6 + $0x401]]  ;;  %v656_v0 = vadd.f32 %v654_v53, %v650_v56  ;;  %v666_v1 = vadd.f32 %v665_v43, %v663_v57  ;;  %v667_v2 = vadd.f32 %v665_v43, %v664_v58 }
  0x83   : > { %v684_v63 = vstv %s1802_s24  ;;  %s1837_s10 = sld [smem:[#allocation6 + $0x402]]  ;;  %v657_v4 = vadd.f32 %v655_v54, %v651_v60  ;;  %v676_v5 = vmul.f32 %v1695_v20, %v675_v55  ;;  %v677_v6 = vmul.f32 %v1703_v24, %v675_v55 }
  0x84   : > { %v691_v3 = vstv %s1807_s25  ;;  %s1840_s23 = sld [smem:[#allocation8 + $0x9]]  ;;  %658 = vst [vmem:[%s1735_s29 + $0x32] sm:$0xff] %v656_v0  ;;  %v672_v8 = vadd.f32 %v670_v61, %v666_v1  ;;  %v673_v9 = vadd.f32 %v671_v62, %v667_v2  ;;  %v685_v10 = vmul.f32 %v684_v63, %v1677_v11 }
  0x85   : > { %v697_v7 = vstv %s1814_s27  ;;  %s1845_s26 = sld [smem:[#allocation6 + $0x480]]  ;;  %659 = vst [vmem:[%s1735_s29 + $0x3a] sm:$0x3] %v657_v4  ;;  %v686_v14 = vmul.f32 %v684_v63, %v1680_v12  ;;  %v692_v17 = vmul.f32 %v1685_v15, %v691_v3  ;;  %v693_v18 = vmul.f32 %v1688_v16, %v691_v3 }
  0x86   : > { %v709_v13 = vstv %s1819_s28  ;;  %s1850_s15 = sld [smem:[#allocation6 + $0x481]]  ;;  %v678_v21 = vadd.f32 %v676_v5, %v672_v8  ;;  %v679_v22 = vadd.f32 %v677_v6, %v673_v9  ;;  %v688_v23 = vadd.f32 %v687_v59, %v685_v10 }
  0x87   : > { %v706_v19 = vstv %s1824_s30  ;;  %s1857_s18 = sld [smem:[#allocation6 + $0x482]]  ;;  %v689_v26 = vadd.f32 %v687_v59, %v686_v14  ;;  %v698_v27 = vmul.f32 %v1695_v20, %v697_v7  ;;  %v699_v28 = vmul.f32 %v1703_v24, %v697_v7 }
  0x88   : > { %v713_v25 = vstv %s1832_s17  ;;  %s1860_s24 = sld [smem:[#allocation8 + $0xa]]  ;;  %680 = vst [vmem:[%s1735_s29 + $0x3c] sm:$0xff] %v678_v21  ;;  %681 = vst [vmem:[%s1735_s29 + $0x44] sm:$0x3] %v679_v22  ;;  %v694_v30 = vadd.f32 %v692_v17, %v688_v23  ;;  %v707_v31 = vmul.f32 %v706_v19, %v1677_v11  ;;  %v708_v32 = vmul.f32 %v706_v19, %v1680_v12 }
  0x89   : > { %v719_v29 = vstv %s1837_s10  ;;  %s1865_s25 = sld [smem:[#allocation6 + $0x500]]  ;;  %v695_v34 = vadd.f32 %v693_v18, %v689_v26  ;;  %v714_v35 = vmul.f32 %v1685_v15, %v713_v25  ;;  %v715_v36 = vmul.f32 %v1688_v16, %v713_v25 }
  0x8a   : > { %v731_v33 = vstv %s1840_s23  ;;  %s1872_s27 = sld [smem:[#allocation6 + $0x501]]  ;;  %v700_v39 = vadd.f32 %v698_v27, %v694_v30  ;;  %v710_v40 = vadd.f32 %v709_v13, %v707_v31  ;;  %v711_v41 = vadd.f32 %v709_v13, %v708_v32 }
  0x8b   : > { %v728_v37 = vstv %s1845_s26  ;;  %s1877_s28 = sld [smem:[#allocation6 + $0x502]]  ;;  %v701_v43 = vadd.f32 %v699_v28, %v695_v34  ;;  %v720_v44 = vmul.f32 %v1695_v20, %v719_v29  ;;  %v721_v45 = vmul.f32 %v1703_v24, %v719_v29 }
  0x8c   : > { %v735_v42 = vstv %s1850_s15  ;;  %s1880_s30 = sld [smem:[#allocation8 + $0xb]]  ;;  %702 = vst [vmem:[%s1735_s29 + $0x46] sm:$0xff] %v700_v39  ;;  %v716_v47 = vadd.f32 %v714_v35, %v710_v40  ;;  %v717_v49 = vadd.f32 %v715_v36, %v711_v41  ;;  %v729_v50 = vmul.f32 %v728_v37, %v1677_v11 }
  0x8d   : > { %v741_v46 = vstv %s1857_s18  ;;  %s1885_s17 = sld [smem:[#allocation6 + $0x580]]  ;;  %703 = vst [vmem:[%s1735_s29 + $0x4e] sm:$0x3] %v701_v43  ;;  %v730_v52 = vmul.f32 %v728_v37, %v1680_v12  ;;  %v736_v53 = vmul.f32 %v1685_v15, %v735_v42  ;;  %v737_v54 = vmul.f32 %v1688_v16, %v735_v42 }
  0x8e   : > { %v753_v51 = vstv %s1860_s24  ;;  %s1890_s10 = sld [smem:[#allocation6 + $0x581]]  ;;  %v1899_v56 = vadd.f32 %v720_v44, %v716_v47  ;;  %v723_v57 = vadd.f32 %v721_v45, %v717_v49  ;;  %v732_v58 = vadd.f32 %v731_v33, %v729_v50 }
  0x8f   : > { %v750_v55 = vstv %s1865_s25  ;;  %s1897_s23 = sld [smem:[#allocation6 + $0x582]]  ;;  %v733_v60 = vadd.f32 %v731_v33, %v730_v52  ;;  %v742_v61 = vmul.f32 %v1695_v20, %v741_v46  ;;  %v743_v62 = vmul.f32 %v1703_v24, %v741_v46 }
  0x90   : > { %v757_v59 = vstv %s1872_s27  ;;  %s1902_s26 = sld [smem:[#allocation8 + $0xc]]  ;;  %724 = vst [vmem:[%s1735_s29 + $0x50] sm:$0xff] %v1899_v56  ;;  %725 = vst [vmem:[%s1735_s29 + $0x58] sm:$0x3] %v723_v57  ;;  %v738_v0 = vadd.f32 %v736_v53, %v732_v58  ;;  %v751_v1 = vmul.f32 %v750_v55, %v1677_v11  ;;  %v752_v2 = vmul.f32 %v750_v55, %v1680_v12 }
  0x91   : > { %v763_v63 = vstv %s1877_s28  ;;  %s1907_s15 = sld [smem:[#allocation6 + $0x600]]  ;;  %v739_v4 = vadd.f32 %v737_v54, %v733_v60  ;;  %v758_v5 = vmul.f32 %v1685_v15, %v757_v59  ;;  %v759_v6 = vmul.f32 %v1688_v16, %v757_v59 }
  0x92   : > { %v775_v3 = vstv %s1880_s30  ;;  %s1915_s18 = sld [smem:[#allocation6 + $0x601]]  ;;  %v744_v8 = vadd.f32 %v742_v61, %v738_v0  ;;  %v754_v9 = vadd.f32 %v753_v51, %v751_v1  ;;  %v755_v10 = vadd.f32 %v753_v51, %v752_v2 }
  0x93   : > { %v772_v7 = vstv %s1885_s17  ;;  %s1920_s24 = sld [smem:[#allocation6 + $0x602]]  ;;  %v745_v14 = vadd.f32 %v743_v62, %v739_v4  ;;  %v764_v17 = vmul.f32 %v1695_v20, %v763_v63  ;;  %v765_v18 = vmul.f32 %v1703_v24, %v763_v63 }
  0x94   : > { %v779_v13 = vstv %s1890_s10  ;;  %s1923_s25 = sld [smem:[#allocation8 + $0xd]]  ;;  %746 = vst [vmem:[%s1735_s29 + $0x5a] sm:$0xff] %v744_v8  ;;  %v760_v21 = vadd.f32 %v758_v5, %v754_v9  ;;  %v761_v22 = vadd.f32 %v759_v6, %v755_v10  ;;  %v773_v23 = vmul.f32 %v772_v7, %v1677_v11 }
  0x95   : > { %v785_v19 = vstv %s1897_s23  ;;  %s1928_s27 = sld [smem:[#allocation6 + $0x680]]  ;;  %747 = vst [vmem:[%s1735_s29 + $0x62] sm:$0x3] %v745_v14  ;;  %v774_v26 = vmul.f32 %v772_v7, %v1680_v12  ;;  %v780_v27 = vmul.f32 %v1685_v15, %v779_v13  ;;  %v781_v28 = vmul.f32 %v1688_v16, %v779_v13 }
  0x96   : > { %v797_v25 = vstv %s1902_s26  ;;  %s1933_s28 = sld [smem:[#allocation6 + $0x681]]  ;;  %v766_v30 = vadd.f32 %v764_v17, %v760_v21  ;;  %v767_v31 = vadd.f32 %v765_v18, %v761_v22  ;;  %v776_v32 = vadd.f32 %v775_v3, %v773_v23 }
  0x97   : > { %v794_v29 = vstv %s1907_s15  ;;  %s1940_s30 = sld [smem:[#allocation6 + $0x682]]  ;;  %v777_v34 = vadd.f32 %v775_v3, %v774_v26  ;;  %v786_v35 = vmul.f32 %v1695_v20, %v785_v19  ;;  %v787_v36 = vmul.f32 %v1703_v24, %v785_v19 }
  0x98   : > { %v801_v33 = vstv %s1915_s18  ;;  %s1943_s17 = sld [smem:[#allocation8 + $0xe]]  ;;  %768 = vst [vmem:[%s1735_s29 + $0x64] sm:$0xff] %v766_v30  ;;  %769 = vst [vmem:[%s1735_s29 + $0x6c] sm:$0x3] %v767_v31  ;;  %v782_v39 = vadd.f32 %v780_v27, %v776_v32  ;;  %v795_v40 = vmul.f32 %v794_v29, %v1677_v11  ;;  %v796_v41 = vmul.f32 %v794_v29, %v1680_v12 }
  0x99   : > { %v807_v37 = vstv %s1920_s24  ;;  %s1948_s10 = sld [smem:[#allocation6 + $0x700]]  ;;  %v783_v43 = vadd.f32 %v781_v28, %v777_v34  ;;  %v802_v44 = vmul.f32 %v1685_v15, %v801_v33  ;;  %v803_v45 = vmul.f32 %v1688_v16, %v801_v33 }
  0x9a   : > { %v819_v42 = vstv %s1923_s25  ;;  %s1955_s23 = sld [smem:[#allocation6 + $0x701]]  ;;  %v788_v47 = vadd.f32 %v786_v35, %v782_v39  ;;  %v798_v49 = vadd.f32 %v797_v25, %v795_v40  ;;  %v799_v50 = vadd.f32 %v797_v25, %v796_v41 }
  0x9b   : > { %v816_v46 = vstv %s1928_s27  ;;  %s1960_s26 = sld [smem:[#allocation6 + $0x702]]  ;;  %v789_v52 = vadd.f32 %v787_v36, %v783_v43  ;;  %v808_v53 = vmul.f32 %v1695_v20, %v807_v37  ;;  %v809_v54 = vmul.f32 %v1703_v24, %v807_v37  ;;  %s1262_s27 = sshll.u32 %s1554_s1, 7 }
  0x9c   : > { %v823_v51 = vstv %s1933_s28  ;;  %s1963_s15 = sld [smem:[#allocation8 + $0xf]]  ;;  %790 = vst [vmem:[%s1735_s29 + $0x6e] sm:$0xff] %v788_v47  ;;  %v804_v57 = vadd.f32 %v802_v44, %v798_v49  ;;  %v805_v58 = vadd.f32 %v803_v45, %v799_v50  ;;  %v817_v59 = vmul.f32 %v816_v46, %v1677_v11  ;;  %s999_s28 = sshll.u32 %s1735_s29, 4  ;;  %s2018_s28 = int_to_ptr.vmem [resolvable:$true] %s999_s28 }
  0x9d   : > { %v829_v55 = vstv %s1940_s30  ;;  %s1968_s18 = sld [smem:[#allocation6 + $0x780]]  ;;  %791 = vst [vmem:[%s1735_s29 + $0x76] sm:$0x3] %v789_v52  ;;  %v818_v61 = vmul.f32 %v816_v46, %v1680_v12  ;;  %v824_v62 = vmul.f32 %v1685_v15, %v823_v51  ;;  %v825_v63 = vmul.f32 %v1688_v16, %v823_v51 }
  0x9e   : > { %v841_v60 = vstv %s1943_s17  ;;  %s1973_s24 = sld [smem:[#allocation6 + $0x781]]  ;;  %v1982_v1 = vadd.f32 %v808_v53, %v804_v57  ;;  %v811_v2 = vadd.f32 %v809_v54, %v805_v58  ;;  %v820_v3 = vadd.f32 %v819_v42, %v817_v59 }
  0x9f   : > { %v838_v0 = vstv %s1948_s10  ;;  %s1980_s25 = sld [smem:[#allocation6 + $0x782]]  ;;  %v821_v5 = vadd.f32 %v819_v42, %v818_v61  ;;  %v830_v6 = vmul.f32 %v1695_v20, %v829_v55  ;;  %v831_v7 = vmul.f32 %v1703_v24, %v829_v55  ;;  %s2016_s10 = scalar_lea.hbm %s2126_s8, %s1262_s27 }
  0xa0   : > { %v845_v4 = vstv %s1955_s23  ;;  %812 = vst [vmem:[%s1735_s29 + $0x78] sm:$0xff] %v1982_v1  ;;  %813 = vst [vmem:[%s1735_s29 + $0x80] sm:$0x3] %v811_v2  ;;  %v826_v9 = vadd.f32 %v824_v62, %v820_v3  ;;  %v839_v10 = vmul.f32 %v838_v0, %v1677_v11  ;;  %v840_v13 = vmul.f32 %v838_v0, %v1680_v12 }
  0xa1   : > { %v851_v8 = vstv %s1960_s26  ;;  %v827_v17 = vadd.f32 %v825_v63, %v821_v5  ;;  %v846_v18 = vmul.f32 %v1685_v15, %v845_v4  ;;  %v847_v19 = vmul.f32 %v1688_v16, %v845_v4  ;;  %s1400_s26 = scalar_lea.vmem %s2018_s28, 2560 }
  0xa2   : > { %v863_v14 = vstv %s1963_s15  ;;  %v832_v22 = vadd.f32 %v830_v6, %v826_v9  ;;  %v842_v23 = vadd.f32 %v841_v60, %v839_v10  ;;  %v843_v25 = vadd.f32 %v841_v60, %v840_v13  ;;  %p1401_p7 = scmp.ne.s32.totalorder %s2018_s28, %s1400_s26  ;;  %s1476_s15 = smov [#allocation10]  }
  0xa3   : > { %v860_v21 = vstv %s1968_s18  ;;  %v833_v27 = vadd.f32 %v831_v7, %v827_v17  ;;  %v852_v28 = vmul.f32 %v1695_v20, %v851_v8  ;;  %v853_v29 = vmul.f32 %v1703_v24, %v851_v8  ;;  %s1404_s18 = sshll.u32 %s1476_s15, 4  ;;  %s1405_s18 = int_to_ptr.vmem [resolvable:$false] %s1404_s18 }
  0xa4   : > { %v867_v26 = vstv %s1973_s24  ;;  %834 = vst [vmem:[%s1735_s29 + $0x82] sm:$0xff] %v832_v22  ;;  %v848_v31 = vadd.f32 %v846_v18, %v842_v23  ;;  %v849_v32 = vadd.f32 %v847_v19, %v843_v25  ;;  %v861_v33 = vmul.f32 %v860_v21, %v1677_v11  ;;  %p1402_p10 = pnand %p1401_p7, %p2152_p11  ;;  %s1406_s24 = scalar_lea.vmem %s1405_s18, 5120 }
  0xa5   : > { %v873_v30 = vstv %s1980_s25  ;;  %835 = vst [vmem:[%s1735_s29 + $0x8a] sm:$0x3] %v833_v27  ;;  %v862_v34 = vmul.f32 %v860_v21, %v1680_v12  ;;  %v868_v35 = vmul.f32 %v1685_v15, %v867_v26  ;;  %v869_v36 = vmul.f32 %v1688_v16, %v867_v26  ;;  %p1407_p9 = scmp.lt.s32.totalorder %s2018_s28, %s1405_s18  ;;  %p1408_p6 = scmp.lt.s32.totalorder %s1406_s24, %s1400_s26 }
  0xa6   : > { %v854_v37 = vadd.f32 %v852_v28, %v848_v31  ;;  %v855_v39 = vadd.f32 %v853_v29, %v849_v32  ;;  %v864_v40 = vadd.f32 %v863_v14, %v861_v33  ;;  %v874_v41 = vmul.f32 %v1695_v20, %v873_v30  ;;  %p1403_p8 = pneg %p1402_p10 }
  0xa7   : > { %v865_v42 = vadd.f32 %v863_v14, %v862_v34  ;;  %v875_v43 = vmul.f32 %v1703_v24, %v873_v30  ;;  %p1409_p12 = por %p1408_p6, %p1407_p9 }
  0xa8   : > { %856 = vst [vmem:[%s1735_s29 + $0x8c] sm:$0xff] %v854_v37  ;;  %857 = vst [vmem:[%s1735_s29 + $0x94] sm:$0x3] %v855_v39  ;;  %v870_v44 = vadd.f32 %v868_v35, %v864_v40 }
  0xa9   : > { %v871_v45 = vadd.f32 %v869_v36, %v865_v42  ;;  %p1410_p0 = pnand %p1409_p12, %p1403_p8 }
  0xaa   : > { %v876_v46 = vadd.f32 %v874_v41, %v870_v44 }
  0xab   : > { %v877_v47 = vadd.f32 %v875_v43, %v871_v45 }
  0xac   : > { %878 = vst [vmem:[%s1735_s29 + $0x96] sm:$0xff] %v876_v46 }
  0xad   : > { %879 = vst [vmem:[%s1735_s29 + $0x9e] sm:$0x3] %v877_v47 }
  0xae   : > { %1413 = shalt.err (!%p1410_p0)
}
  0xaf   : > { %s1414_s25 = scalar_lea.hbm %s2016_s10, 2560  ;;  %s1418_s17 = scalar_lea.hbm %s2126_s8, 5120 }
  0xb0   : > { %p1415_p2 = scmp.ne.s32.totalorder %s2016_s10, %s1414_s25  ;;  %p1419_p3 = scmp.lt.s32.totalorder %s2016_s10, %s2126_s8 }
  0xb1   : > { %p1420_p7 = scmp.lt.s32.totalorder %s1418_s17, %s1414_s25 }
  0xb2   : > { %p1416_p13 = pnand %p1415_p2, %p2152_p11 }
  0xb3   : > { %p1421_p10 = por %p1420_p7, %p1419_p3 }
  0xb4   : > { %p1417_p1 = pneg %p1416_p13 }
  0xb6   : > { %p1422_p8 = pnand %p1421_p10, %p1417_p1 }
  0xb8   : > { %1425 = shalt.err (!%p1422_p8)
}
  0xb9   : > { %s1477_s26 = smov 128   ;;  %s1478_s18 = smov 256   ;;  %v488_v55 = vlaneseq  ;;  %v881_v30 = vld [vmem:[%s1735_s29 + $0x8] sm:$0xff]  ;;  %v890_v31 = vld [vmem:[%s1735_s29 + $0x10] sm:$0xff]  ;;  %v891_v32 = vld [vmem:[%s1735_s29 + $0x18] sm:$0xff] }
  0xba   : > { %s1479_s24 = smov 8   ;;  %s2153_s27 = scalar_lea.sflag [#allocation4], %s1653_s20  ;;  %v900_v37 = vld [vmem:[%s1735_s29 + $0x20] sm:$0xff]  ;;  %v910_v46 = vld [vmem:[%s1735_s29 + $0x30] sm:$0xff]  ;;  %v911_v47 = vld [vmem:[%s1735_s29 + $0x38] sm:$0xff] }
  0xbb   : > { %1281 = dma.vmem_to_hbm [thread:$0]  (%p2152_p11), %s2018_s28, 2560, %s2016_s10, %s2153_s27, %s1477_s26, %s1478_s18, %s1479_s24   ;;  %v2052_v61 = vshrl.u32 %v488_v55, 7 }
  0xbc   : > { %s449_s30 = scalar_select %p448_p4, %s1554_s1, 1 }
  0xbd   : > { %s452_s23 = sld [smem:[#allocation3]]  ;;  %v2060_v8 = vsub.s32 0, %v2052_v61  ;;  %v894_v25 = vsub.s32 1, %v2052_v61  ;;  %v904_v26 = vsub.s32 2, %v2052_v61  ;;  %v914_v28 = vsub.s32 3, %v2052_v61  ;;  %s1191_s0 = sshll.u32 %s1653_s20, 4 }
  0xbe   : > { %s455_s15 = sld [smem:[#allocation2]]  ;;  %s1192_s25 = sshll.u32 %s449_s30, 2  ;;  %v924_v33 = vsub.s32 4, %v2052_v61  ;;  %v934_v40 = vsub.s32 5, %v2052_v61 }
  0xbf   : > { %s1193_s17 = sld [smem:[#allocation3 + $0x1]]  ;;  %s451_s3 = scalar_lea.vmem %s2125_s7, %s1192_s25 }
  0xc0   : > { %s1194_s4 = sld [smem:[#allocation3 + $0x2]]  ;;  %v465_v49 = vld [vmem:[%s451_s3] sm:$0x1]  ;;  %v470_v53 = vld [vmem:[%s451_s3 + $0x1] sm:$0x1]  ;;  %s447_s2 = scalar_lea.vmem [#allocation11], %s1191_s0 }
  0xc1   : > { %v474_v59 = vld [vmem:[%s451_s3 + $0x2] sm:$0x1]  ;;  %s1263_s3 = sshll.u32 (%p2152_p11), %s1554_s1, 3 }
  0xc2   : > { %s1010_s20 = scalar_lea.vmem (%p2152_p11), %s2127_s9, %s1263_s3 }
  0xc3   : > { %v466_v50 = vstv %s452_s23 }
  0xc4   : > { %s464_s5 = smul.f32 2.0, %s455_s15  ;;  %v467_v51 = vmul.f32 %v466_v50, %v465_v49  ;;  %v478_v0 = vmul.f32 %v466_v50, %v1677_v11  ;;  %v479_v3 = vmul.f32 %v466_v50, %v1680_v12  ;;  %v944_v50 = vsub.s32 6, %v2052_v61 }
  0xc5   : > { %v471_v54 = vstv %s1193_s17 }
  0xc6   : > { %v468_v52 = vstv %s464_s5  ;;  %v472_v58 = vmul.f32 %v471_v54, %v470_v53  ;;  %v475_v60 = vstv %s1194_s4  ;;  %v480_v2 = vmul.f32 %v1685_v15, %v471_v54 }
  0xc7   : > { %v469_v57 = vadd.f32 %v468_v52, %v467_v51  ;;  %v476_v63 = vmul.f32 %v475_v60, %v474_v59  ;;  %v481_v4 = vmul.f32 %v1688_v16, %v471_v54  ;;  %v484_v7 = vmul.f32 %v1695_v20, %v475_v60 }
  0xc8   : > { %v482_v6 = vadd.f32 %v480_v2, %v478_v0  ;;  %v485_v10 = vmul.f32 %v1703_v24, %v475_v60  ;;  %v954_v59 = vsub.s32 7, %v2052_v61 }
  0xc9   : > { %v473_v62 = vadd.f32 %v472_v58, %v469_v57  ;;  %v483_v9 = vadd.f32 %v481_v4, %v479_v3  ;;  %v920_v57 = vld [vmem:[%s1735_s29 + $0x40] sm:$0xff]  ;;  %v921_v58 = vld [vmem:[%s1735_s29 + $0x48] sm:$0xff]  ;;  %v931_v3 = vld [vmem:[%s1735_s29 + $0x58] sm:$0xff] }
  0xca   : > { %v486_v13 = vadd.f32 %v484_v7, %v482_v6 }
  0xcb   : > { %v477_v5 = vadd.f32 %v476_v63, %v473_v62  ;;  %v487_v11 = vadd.f32 %v485_v10, %v483_v9  ;;  %v940_v9 = vld [vmem:[%s1735_s29 + $0x60] sm:$0xff] }
  0xcd   : > { %v491_v14 = vrot.slane %v477_v5, %v2060_v8 }
  0xcf   : > { %v492_v17 = vadd.f32 %v491_v14, %v486_v13  ;;  %v493_v18 = vadd.f32 %v491_v14, %v487_v11  ;;  %v941_v13 = vld [vmem:[%s1735_s29 + $0x68] sm:$0xff] }
  0xe0   : > { %v499_v15 = vpop.permute.xlu0 %498  ;;  %v504_v19 = vpop.permute.xlu1 %503 }
  0xe1   : > { %v506_v12 = vsub.f32 %v492_v17, %v499_v15  ;;  %v507_v20 = vsub.f32 %v493_v18, %v504_v19  ;;  %v950_v18 = vld [vmem:[%s1735_s29 + $0x70] sm:$0xff] }
  0xe3   : > { %v508_v16 = vmul.f32 1.442695, %v506_v12  ;;  %v510_v22 = vmul.f32 1.442695, %v507_v20  ;;  %v960_v20 = vld [vmem:[%s1735_s29 + $0x80] sm:$0xff] }
  0xe4   : > { %v517_v21 = vpop.permute.xlu0 %516  ;;  %v522_v23 = vpop.permute.xlu1 %521 }
  0xe5   : > { %1347 = vpow2.f32 %v508_v16 }
  0xe6   : > { %1349 = vrcp.f32 %v517_v21 }
  0xe7   : > { %1351 = vpow2.f32 %v510_v22  ;;  %v961_v22 = vld [vmem:[%s1735_s29 + $0x88] sm:$0xff] }
  0xe8   : > { %1353 = vrcp.f32 %v522_v23 }
  0xf2   : > { %v1348_v24 = vpop.eup %1347 }
  0xf3   : > { %v1350_v27 = vpop.eup %1349 }
  0xf4   : > { %v525_v29 = vmul.f32 %v1350_v27, %v1348_v24  ;;  %v1352_v45 = vpop.eup %1351 }
  0xf5   : > { %v1354_v51 = vpop.eup %1353 }
  0xf6   : > { %v885_v34 = vrot.slane %v525_v29, %v2060_v8  ;;  %v895_v35 = vrot.slane %v525_v29, %v894_v25  ;;  %v905_v36 = vrot.slane %v525_v29, %v904_v26  ;;  %v915_v39 = vrot.slane %v525_v29, %v914_v28  ;;  %v970_v28 = vld [vmem:[%s1735_s29 + $0x90] sm:$0xff] }
  0xf7   : > { %v925_v49 = vrot.slane %v525_v29, %v924_v33  ;;  %v527_v2 = vmul.f32 %v1354_v51, %v1352_v45  ;;  %v945_v4 = vrot.slane %v525_v29, %v944_v50  ;;  %v955_v17 = vrot.slane %v525_v29, %v954_v59 }
  0xf8   : > { %v886_v41 = vmul.f32 %v885_v34, %v1724_v38  ;;  %v887_v42 = vmul.f32 %v885_v34, %v881_v30  ;;  %v896_v43 = vmul.f32 %v895_v35, %v890_v31  ;;  %v897_v44 = vmul.f32 %v895_v35, %v891_v32  ;;  %v971_v30 = vld [vmem:[%s1735_s29 + $0x98] sm:$0xff] }
  0xf9   : > { %v906_v54 = vmul.f32 %v905_v36, %v900_v37  ;;  %v907_v55 = vmul.f32 %v905_v36, %v1816_v48  ;;  %v935_v38 = vrot.slane %v525_v29, %v934_v40  ;;  %v916_v63 = vmul.f32 %v915_v39, %v910_v46 }
  0xfa   : > { %v898_v52 = vadd.f32 %v896_v43, %v886_v41  ;;  %v899_v53 = vadd.f32 %v897_v44, %v887_v42  ;;  %v917_v0 = vmul.f32 %v915_v39, %v911_v47  ;;  %v926_v7 = vmul.f32 %v925_v49, %v920_v57 }
  0xfb   : > { %v927_v48 = vmul.f32 %v925_v49, %v921_v58  ;;  %v936_v10 = vmul.f32 %v935_v38, %v1899_v56  ;;  %v937_v11 = vmul.f32 %v935_v38, %v931_v3  ;;  %v946_v15 = vmul.f32 %v945_v4, %v940_v9 }
  0xfc   : > { %v908_v60 = vadd.f32 %v906_v54, %v898_v52  ;;  %v909_v62 = vadd.f32 %v907_v55, %v899_v53  ;;  %v947_v16 = vmul.f32 %v945_v4, %v941_v13  ;;  %v965_v21 = vrot.slane %v527_v2, %v2060_v8 }
  0xfd   : > { %v975_v23 = vrot.slane %v527_v2, %v894_v25  ;;  %v956_v26 = vmul.f32 %v955_v17, %v950_v18  ;;  %v957_v27 = vmul.f32 %v955_v17, %v1982_v1 }
  0xfe   : > { %v918_v5 = vadd.f32 %v916_v63, %v908_v60  ;;  %v919_v6 = vadd.f32 %v917_v0, %v909_v62  ;;  %v966_v32 = vmul.f32 %v965_v21, %v960_v20  ;;  %v967_v33 = vmul.f32 %v965_v21, %v961_v22 }
  0xff   : > { %v976_v36 = vmul.f32 %v975_v23, %v970_v28  ;;  %v977_v37 = vmul.f32 %v975_v23, %v971_v30 }
 0x100   : > { %v928_v14 = vadd.f32 %v926_v7, %v918_v5  ;;  %v929_v61 = vadd.f32 %v927_v48, %v919_v6 }
 0x102   : > { %v938_v12 = vadd.f32 %v936_v10, %v928_v14  ;;  %v939_v19 = vadd.f32 %v937_v11, %v929_v61 }
 0x104   : > { %v948_v24 = vadd.f32 %v946_v15, %v938_v12  ;;  %v949_v56 = vadd.f32 %v947_v16, %v939_v19 }
 0x106   : > { %v958_v29 = vadd.f32 %v956_v26, %v948_v24  ;;  %v959_v31 = vadd.f32 %v957_v27, %v949_v56 }
 0x108   : > { %v968_v34 = vadd.f32 %v966_v32, %v958_v29  ;;  %v969_v35 = vadd.f32 %v967_v33, %v959_v31  ;;  %1008 = sbr.rel (!%p2152_p11) target bundleno = 277 (0x115), region = 110 }
 0x10a   : > { %v978_v8 = vadd.f32 %v976_v36, %v968_v34  ;;  %v979_v39 = vadd.f32 %v977_v37, %v969_v35 }
 0x10c   : > { %980 = vst [vmem:[%s447_s2] sm:$0xff] %v978_v8  ;;  %981 = vst [vmem:[%s447_s2 + $0x8] sm:$0xff] %v979_v39 }
 0x113   : > { %v1041_v1 = vld [vmem:[%s447_s2] sm:$0xff]  ;;  %v1043_v25 = vld [vmem:[%s447_s2 + $0x8] sm:$0xff] }
 0x114   : > { %1042 = vst [vmem:[%s1010_s20] sm:$0xff] %v1041_v1  ;;  %1044 = vst [vmem:[%s1010_s20 + $0x10] sm:$0xff] %v1043_v25 }
 0x115 PF: > { %s1056_s29 = sand.u32 1, %s1456_s11   ;;  %p2154_p4 = scmp.ne.s32.totalorder %s2138_s22, 0 }
 0x116   : > { %s1057_s21 = scalar_lea.sflag [#allocation4], %s1056_s29 }
 0x117   : > { %p1294_p9 = pnand %p1185_p5, %p2154_p4 }
 0x119   : > { %p1295_p11 = pneg %p1294_p9 }
 0x11b   : > { %1451 = dma.done.wait (%p1295_p11), %s1057_s21, 2560  }
 0x11c   : > { %1453 = vsyncadd (%p1295_p11), %s1057_s21, 4294964736  ;;  %p23_p6 = scmp.ge.s32.totalorder %s1558_s16, 4   ;;  %s2155_s11 = smov %s1460_s12 }
 0x11d   : > { %s2156_s12 = smov %s1464_s13  ;;  %s2157_s13 = smov %s1570_s19 }
 0x11e   : > { %s2158_s14 = smov %s1558_s16  ;;  %25 = sbr.rel (!%p23_p6) target bundleno = 12 (0xc), region = 198 }
 0x123   :  { %1069 = vsyncpa [#allocation4], 1 }
 0x124   :  { %1071 = vsyncpa [#allocation4 + $0x1], 1 }
 0x125   :  { %1072 = vsyncpa [#allocation5], 1 }
 0x126   :  { %1074 = vsyncpa [#allocation5 + $0x1], 1 }
 0x127   :  { %1075 = vsyncpa [#allocation7], 1 }

</bundles_post_ra>
